<compile_context>
chip_gen: v7x
topology: tpu7x:2x2x1
jax: 0.10.0
libtpu: 0.0.40
codegen_flags: <defaults>
</compile_context>

<pallas_src>
import functools

import jax
import jax.numpy as jnp
from jax.experimental import pallas as pl
from jax.experimental.pallas import tpu as pltpu

LN_EPS = 1e-5  # torch.nn.LayerNorm default


def _layernorm(x, gamma, beta):
    # x: (N, D) f32; gamma/beta: (1, D) f32.  Biased variance, as in torch.
    mu = jnp.mean(x, axis=-1, keepdims=True)
    var = jnp.mean((x - mu) ** 2, axis=-1, keepdims=True)
    return (x - mu) * jax.lax.rsqrt(var + LN_EPS) * gamma + beta


# ---------------------------------------------------------------------------
# Fused kernel: one grid step = (layer l, batch element b).  The residual stream
# lives in the resident (B, N, D) output block across the whole grid.
# ---------------------------------------------------------------------------
def transformer_layer_kernel(x_ref, vec_ref, b1_ref, wqkvt_ref, wo_ref, w1_ref, w2_ref,
                             o_ref, *, heads, dim_head):
    layer = pl.program_id(0)
    b = pl.program_id(1)
    n_tok = x_ref.shape[1]

    # Load this batch element's input into the resident output block once (layer 0).
    @pl.when(layer == 0)
    def _():
        o_ref[b] = x_ref[0].astype(o_ref.dtype)

    x = o_ref[b].astype(jnp.float32)             # (N, D) residual stream, VMEM-resident

    vec = vec_ref[0]                             # (8, D) f32 packed per-layer vectors
    ln1_g, ln1_b = vec[0:1], vec[1:2]
    bo = vec[2:3]
    ln2_g, ln2_b = vec[3:4], vec[4:5]
    b2 = vec[5:6]
    b1 = b1_ref[0]                               # (1, mlp_dim) f32

    # ------------------------- Attention (PreNorm) -------------------------
    xn = _layernorm(x, ln1_g, ln1_b).astype(jnp.bfloat16)                 # (N, D)
    # qkv^T = Wqkv^T @ xn^T, computed as an A @ B^T contraction over D (the minor dim
    # of both operands).  Softmax scale is pre-folded into the q rows of Wqkv^T.
    qkv_t = jnp.einsum("ed,nd->en", wqkvt_ref[0], xn,
                       preferred_element_type=jnp.float32)                # (3*H*dh, N) f32
    # Head split is a sublane-only reshape (dim_head is a multiple of 8); the lane
    # dim (N) is untouched -> no per-head lane slicing / stack / concat relayouts.
    qkv_t = qkv_t.reshape(3, heads, dim_head, n_tok)
    q = jnp.swapaxes(qkv_t[0], 1, 2).astype(jnp.bfloat16)                 # (H, N, dh)
    kt = qkv_t[1].astype(jnp.bfloat16)                                    # (H, dh, N)
    vt = qkv_t[2].astype(jnp.bfloat16)                                    # (H, dh, N)

    # Head-batched scores + numerically stable softmax (kept f32 on the VPU/EUP).
    s = jnp.einsum("hnd,hdm->hnm", q, kt, preferred_element_type=jnp.float32)
    s = s - jnp.max(s, axis=-1, keepdims=True)
    p = jnp.exp(s)
    denom = jnp.sum(p, axis=-1, keepdims=True)                            # (H, N, 1)
    ctx = jnp.einsum("hnm,hdm->hnd", p.astype(jnp.bfloat16), vt,
                     preferred_element_type=jnp.float32)                  # (H, N, dh)
    # Normalize after P@V: H*N*dh multiplies, reciprocal on the EUP slot.
    ctx = (ctx * pl.reciprocal(denom, approx=True)).astype(jnp.bfloat16)

    # Heads folded into the output projection (head-batched matmul + head-sum).
    attn = jnp.einsum("hnd,hdk->hnk", ctx, wo_ref[0],
                      preferred_element_type=jnp.float32)                 # (H, N, D)
    x = x + jnp.sum(attn, axis=0) + bo                                    # residual

    # ------------------------- FeedForward (PreNorm) -----------------------
    xn2 = _layernorm(x, ln2_g, ln2_b).astype(jnp.bfloat16)
    hid = jnp.dot(xn2, w1_ref[0], preferred_element_type=jnp.float32) + b1
    # Exact (erf) GELU in f32, matching torch.nn.GELU's default.
    hid = 0.5 * hid * (1.0 + jax.lax.erf(hid * 0.7071067811865476))
    y = jnp.dot(hid.astype(jnp.bfloat16), w2_ref[0],
                preferred_element_type=jnp.float32) + b2
    x = x + y                                                             # residual

    o_ref[b] = x.astype(o_ref.dtype)
    # TODO(synk): for long sequences, add flash-style KV tiling with an online softmax
    # so the (H, N, N) score/prob tensors never materialize (needed on v7x at N >~ 1024).


# ---------------------------------------------------------------------------
# VMEM budget derived from actual slab sizes (weights double-buffered).
# ---------------------------------------------------------------------------
def _pick_vmem_limit(B, N, D, inner, mlp_dim, heads, dim_head):
    bf16, f32 = 2, 4
    w_layer = (3 * inner * D + inner * D + D * mlp_dim + mlp_dim * D) * bf16
    small = (8 * D + mlp_dim) * f32
    acts = (B * N * D + 2 * N * D) * f32
    inter = (3 * inner * N + 3 * heads * N * N + heads * N * (dim_head + D)
             + 2 * N * mlp_dim + 6 * N * D) * f32
    est = 2 * (w_layer + small) + acts + inter
    try:
        cap = int(pltpu.get_tpu_info().vmem_capacity_bytes) * 3 // 4
    except Exception:
        cap = 48 * 1024 * 1024  # conservative fallback (v7x physical VMEM is 64 MiB)
    return int(min(max(2 * est, 32 * 1024 * 1024), max(cap, 32 * 1024 * 1024)))


# ---------------------------------------------------------------------------
# Wrapper: one pallas_call for the whole Transformer.
# ---------------------------------------------------------------------------
def transformer_forward(x, sp, heads, dim_head):
    x = x.astype(jnp.float32)
    B, N, D = x.shape
    depth = sp["wqkv_t"].shape[0]
    inner = heads * dim_head
    mlp_dim = sp["w1"].shape[-1]

    def wspec(arr):  # per-layer weight slab; block index depends only on the layer axis
        nd = arr.ndim
        return pl.BlockSpec((1,) + arr.shape[1:],
                            lambda l, b, _n=nd: (l,) + (0,) * (_n - 1))

    # x is only consumed at layer 0; afterwards its block index collapses to 0 so the
    # pipeline does not keep re-fetching it.
    x_spec = pl.BlockSpec((1, N, D), lambda l, b: (jnp.where(l == 0, b, 0), 0, 0))
    # Resident output block (constant index map): acts as the f32 residual stream for
    # the whole grid and is written back to HBM exactly once.
    out_spec = pl.BlockSpec((B, N, D), lambda l, b: (0, 0, 0))

    kern = functools.partial(transformer_layer_kernel, heads=heads, dim_head=dim_head)

    return pl.pallas_call(
        kern,
        out_shape=jax.ShapeDtypeStruct((B, N, D), jnp.float32),
        grid=(depth, B),  # depth outer, B inner -> each layer's weights DMA'd once
        in_specs=[
            x_spec,
            wspec(sp["vecs"]), wspec(sp["b1"]),
            wspec(sp["wqkv_t"]), wspec(sp["wo_h"]),
            wspec(sp["w1"]), wspec(sp["w2"]),
        ],
        out_specs=out_spec,
        compiler_params=pltpu.CompilerParams(
            # Both axes must be "arbitrary": the resident output block is shared state
            # across the whole grid.
            # TODO(synk): on v7x (2 TensorCores) add an independent parallel axis
            # (e.g. row tiles of the FF/projections) so both cores are used.
            dimension_semantics=("arbitrary", "arbitrary"),
            vmem_limit_bytes=_pick_vmem_limit(B, N, D, inner, mlp_dim, heads, dim_head)),
    )(x, sp["vecs"], sp["b1"], sp["wqkv_t"], sp["wo_h"], sp["w1"], sp["w2"])


# ---------------------------------------------------------------------------
# Parameter handling
# ---------------------------------------------------------------------------
def init_params(key, dim, depth, heads, dim_head, mlp_dim):
    inner = heads * dim_head
    layers = []
    for _ in range(depth):
        key, k1, k2, k3, k4, k5, k6 = jax.random.split(key, 7)
        attn_p = {
            "ln_g": jnp.ones((1, dim), jnp.float32),
            "ln_b": jnp.zeros((1, dim), jnp.float32),
            "wqkv": 0.02 * jax.random.normal(k1, (dim, 3 * inner), jnp.float32),
            "wo":   0.02 * jax.random.normal(k2, (inner, dim), jnp.float32),
            "bo":   0.01 * jax.random.normal(k3, (1, dim), jnp.float32),
        }
        ff_p = {
            "ln_g": jnp.ones((1, dim), jnp.float32),
            "ln_b": jnp.zeros((1, dim), jnp.float32),
            "w1":   0.02 * jax.random.normal(k4, (dim, mlp_dim), jnp.float32),
            "b1":   0.01 * jax.random.normal(k5, (1, mlp_dim), jnp.float32),
            "w2":   0.02 * jax.random.normal(k6, (mlp_dim, dim), jnp.float32),
            "b2":   jnp.zeros((1, dim), jnp.float32),
        }
        layers.append((attn_p, ff_p))
    return layers


def stack_params(layers, heads, dim_head):
    """Stack per-layer params along a leading depth axis with kernel-friendly layouts.

      * wqkv stored transposed, (depth, 3*inner, D) bf16, with 1/sqrt(dim_head) folded
        into the q rows at trace time (zero kernel cost).
      * wo stored head-major, (depth, heads, dim_head, D) bf16, so the head concat is
        folded into the output projection.
      * The six (1, D) vectors are packed into one (depth, 8, D) f32 array.
    """
    depth = len(layers)
    attn = [a for a, _ in layers]
    ff = [f for _, f in layers]
    D = attn[0]["ln_g"].shape[-1]
    inner = heads * dim_head

    wqkv = jnp.stack([a["wqkv"] for a in attn], axis=0)          # (depth, D, 3*inner)
    wqkv = wqkv.at[:, :, :inner].multiply(dim_head ** -0.5)      # fold softmax scale
    wqkv_t = jnp.swapaxes(wqkv, 1, 2)                            # (depth, 3*inner, D)

    wo = jnp.stack([a["wo"] for a in attn], axis=0)              # (depth, inner, D)
    wo_h = wo.reshape(depth, heads, dim_head, D)

    zero = jnp.zeros((1, D), jnp.float32)
    vecs = jnp.stack([
        jnp.concatenate([a["ln_g"], a["ln_b"], a["bo"],
                         f["ln_g"], f["ln_b"], f["b2"], zero, zero], axis=0)
        for a, f in layers], axis=0)                             # (depth, 8, D)

    return {
        "vecs": vecs.astype(jnp.float32),
        "b1": jnp.stack([f["b1"] for f in ff], axis=0).astype(jnp.float32),  # (depth,1,mlp)
        "wqkv_t": wqkv_t.astype(jnp.bfloat16),
        "wo_h": wo_h.astype(jnp.bfloat16),
        "w1": jnp.stack([f["w1"] for f in ff], axis=0).astype(jnp.bfloat16),
        "w2": jnp.stack([f["w2"] for f in ff], axis=0).astype(jnp.bfloat16),
    }


# ---------------------------------------------------------------------------
# Pure-JAX f32 reference (matches the PyTorch module; dropout=0 -> identity)
# ---------------------------------------------------------------------------
def _ref_ln(x, g, b):
    mu = jnp.mean(x, axis=-1, keepdims=True)
    var = jnp.mean((x - mu) ** 2, axis=-1, keepdims=True)
    return (x - mu) / jnp.sqrt(var + LN_EPS) * g + b


def reference_forward(x, layers, heads, dim_head):
    for ap, fp in layers:
        xn = _ref_ln(x, ap["ln_g"], ap["ln_b"])
        qkv = xn @ ap["wqkv"]
        B, N, _ = x.shape
        inner = heads * dim_head
        q, k, v = jnp.split(qkv, 3, axis=-1)
        def heads_split(t):
            return t.reshape(B, N, heads, dim_head).transpose(0, 2, 1, 3)
        q, k, v = map(heads_split, (q, k, v))
        dots = jnp.einsum("bhnd,bhmd->bhnm", q, k) * dim_head ** -0.5
        attn = jax.nn.softmax(dots, axis=-1)
        out = jnp.einsum("bhnm,bhmd->bhnd", attn, v)
        out = out.transpose(0, 2, 1, 3).reshape(B, N, inner)
        x = out @ ap["wo"] + ap["bo"] + x

        xn = _ref_ln(x, fp["ln_g"], fp["ln_b"])
        h = xn @ fp["w1"] + fp["b1"]
        h = 0.5 * h * (1.0 + jax.lax.erf(h * 2.0 ** -0.5))
        x = h @ fp["w2"] + fp["b2"] + x
    return x


if __name__ == "__main__":
    # Small but layout-friendly shapes (lane dims multiples of 128, N multiple of 8).
    B, N = 2, 16
    dim, depth, heads, dim_head, mlp_dim = 128, 2, 4, 64, 256

    key = jax.random.PRNGKey(0)
    key, kx = jax.random.split(key)
    x = jax.random.normal(kx, (B, N, dim), jnp.float32)

    layers = init_params(key, dim, depth, heads, dim_head, mlp_dim)
    sp = stack_params(layers, heads, dim_head)

    out = jax.block_until_ready(transformer_forward(x, sp, heads, dim_head))
    ref = reference_forward(x, layers, heads, dim_head)

    assert out.shape == (B, N, dim)
    # bf16 matmul inputs + approx reciprocal -> small drift vs the pure-f32 reference.
    assert jnp.allclose(out, ref, atol=3e-2, rtol=3e-2), "mismatch vs JAX reference"

    print("KERNEL_OK")
</pallas_src>

<mosaic_0001>
module attributes {stable_mosaic.version = 11 : i64} {
  func.func @transformer_layer_kernel(%arg0: i32, %arg1: i32, %arg2: memref<1x16x128xf32, #tpu.memory_space<vmem>>, %arg3: memref<1x8x128xf32, #tpu.memory_space<vmem>>, %arg4: memref<1x1x256xf32, #tpu.memory_space<vmem>>, %arg5: memref<1x768x128xbf16, #tpu.memory_space<vmem>>, %arg6: memref<1x4x64x128xbf16, #tpu.memory_space<vmem>>, %arg7: memref<1x128x256xbf16, #tpu.memory_space<vmem>>, %arg8: memref<1x256x128xbf16, #tpu.memory_space<vmem>>, %arg9: memref<2x16x128xf32, #tpu.memory_space<vmem>>) attributes {dimension_semantics = [#tpu.dimension_semantics<arbitrary>, #tpu.dimension_semantics<arbitrary>], iteration_bounds = array<i64: 2, 2>, scalar_prefetch = 0 : i64, scratch_operands = 0 : i64, tpu.core_type = #tpu.core_type<tc>, window_params = [{transform_indices = @transform_0, window_bounds = array<i64: 1, 16, 128>}, {transform_indices = @transform_1, window_bounds = array<i64: 1, 8, 128>}, {transform_indices = @transform_2, window_bounds = array<i64: 1, 1, 256>}, {transform_indices = @transform_3, window_bounds = array<i64: 1, 768, 128>}, {transform_indices = @transform_4, window_bounds = array<i64: 1, 4, 64, 128>}, {transform_indices = @transform_5, window_bounds = array<i64: 1, 128, 256>}, {transform_indices = @transform_6, window_bounds = array<i64: 1, 256, 128>}, {pipeline_mode = #tpu.pipeline_mode<synchronous>, transform_indices = @transform_7, window_bounds = array<i64: 2, 16, 128>}]} {
    %c0_i32 = arith.constant 0 : i32
    %0 = arith.cmpi eq, %arg0, %c0_i32 : i32
    %1 = arith.extui %0 : i1 to i32
    %c0_i32_0 = arith.constant 0 : i32
    %2 = arith.cmpi ne, %1, %c0_i32_0 : i32
    scf.if %2 {
      %c0_44 = arith.constant 0 : index
      %c0_45 = arith.constant 0 : index
      %c0_46 = arith.constant 0 : index
      %121 = vector.load %arg2[%c0_44, %c0_45, %c0_46] : memref<1x16x128xf32, #tpu.memory_space<vmem>>, vector<1x16x128xf32>
      %122 = vector.shape_cast %121 : vector<1x16x128xf32> to vector<16x128xf32>
      %123 = arith.index_cast %arg1 : i32 to index
      %c0_47 = arith.constant 0 : index
      %c0_48 = arith.constant 0 : index
      %124 = vector.load %arg9[%123, %c0_47, %c0_48] : memref<2x16x128xf32, #tpu.memory_space<vmem>>, vector<1x16x128xf32>
      %125 = vector.shape_cast %124 : vector<1x16x128xf32> to vector<16x128xf32>
      %126 = vector.shape_cast %122 : vector<16x128xf32> to vector<1x16x128xf32>
      tpu.vector_store %arg9[%123, %c0_47, %c0_48], %126 {strides = array<i32>} : memref<2x16x128xf32, #tpu.memory_space<vmem>>, vector<1x16x128xf32>,
    } else {
    }
    %3 = arith.index_cast %arg1 : i32 to index
    %c0 = arith.constant 0 : index
    %c0_1 = arith.constant 0 : index
    %4 = vector.load %arg9[%3, %c0, %c0_1] : memref<2x16x128xf32, #tpu.memory_space<vmem>>, vector<1x16x128xf32>
    %5 = vector.shape_cast %4 : vector<1x16x128xf32> to vector<16x128xf32>
    %c0_2 = arith.constant 0 : index
    %c0_3 = arith.constant 0 : index
    %c0_4 = arith.constant 0 : index
    %6 = vector.load %arg3[%c0_2, %c0_3, %c0_4] : memref<1x8x128xf32, #tpu.memory_space<vmem>>, vector<1x8x128xf32>
    %7 = vector.shape_cast %6 : vector<1x8x128xf32> to vector<8x128xf32>
    %8 = vector.extract_strided_slice %7 {offsets = [0, 0], sizes = [1, 128], strides = [1, 1]} : vector<8x128xf32> to vector<1x128xf32>
    %9 = vector.extract_strided_slice %7 {offsets = [1, 0], sizes = [1, 128], strides = [1, 1]} : vector<8x128xf32> to vector<1x128xf32>
    %10 = vector.extract_strided_slice %7 {offsets = [2, 0], sizes = [1, 128], strides = [1, 1]} : vector<8x128xf32> to vector<1x128xf32>
    %11 = vector.extract_strided_slice %7 {offsets = [3, 0], sizes = [1, 128], strides = [1, 1]} : vector<8x128xf32> to vector<1x128xf32>
    %12 = vector.extract_strided_slice %7 {offsets = [4, 0], sizes = [1, 128], strides = [1, 1]} : vector<8x128xf32> to vector<1x128xf32>
    %13 = vector.extract_strided_slice %7 {offsets = [5, 0], sizes = [1, 128], strides = [1, 1]} : vector<8x128xf32> to vector<1x128xf32>
    %c0_5 = arith.constant 0 : index
    %c0_6 = arith.constant 0 : index
    %c0_7 = arith.constant 0 : index
    %14 = vector.load %arg4[%c0_5, %c0_6, %c0_7] : memref<1x1x256xf32, #tpu.memory_space<vmem>>, vector<1x1x256xf32>
    %15 = vector.shape_cast %14 : vector<1x1x256xf32> to vector<1x256xf32>
    %cst = arith.constant dense<0.000000e+00> : vector<16xf32>
    %16 = vector.multi_reduction <add>, %5, %cst [1] : vector<16x128xf32> to vector<16xf32>
    %17 = vector.shape_cast %16 : vector<16xf32> to vector<16x1xf32>
    %cst_8 = arith.constant 1.280000e+02 : f32
    %18 = vector.broadcast %cst_8 : f32 to vector<16x1xf32>
    %19 = arith.divf %17, %18 : vector<16x1xf32>
    %20 = vector.broadcast %19 : vector<16x1xf32> to vector<16x128xf32>
    %21 = arith.subf %5, %20 : vector<16x128xf32>
    %22 = arith.mulf %21, %21 : vector<16x128xf32>
    %cst_9 = arith.constant dense<0.000000e+00> : vector<16xf32>
    %23 = vector.multi_reduction <add>, %22, %cst_9 [1] : vector<16x128xf32> to vector<16xf32>
    %24 = vector.shape_cast %23 : vector<16xf32> to vector<16x1xf32>
    %cst_10 = arith.constant 1.280000e+02 : f32
    %25 = vector.broadcast %cst_10 : f32 to vector<16x1xf32>
    %26 = arith.divf %24, %25 : vector<16x1xf32>
    %27 = vector.broadcast %19 : vector<16x1xf32> to vector<16x128xf32>
    %28 = arith.subf %5, %27 : vector<16x128xf32>
    %cst_11 = arith.constant 9.99999974E-6 : f32
    %29 = vector.broadcast %cst_11 : f32 to vector<16x1xf32>
    %30 = arith.addf %26, %29 : vector<16x1xf32>
    %31 = math.rsqrt %30 : vector<16x1xf32>
    %32 = vector.broadcast %31 : vector<16x1xf32> to vector<16x128xf32>
    %33 = arith.mulf %28, %32 : vector<16x128xf32>
    %34 = vector.broadcast %8 : vector<1x128xf32> to vector<16x128xf32>
    %35 = arith.mulf %33, %34 : vector<16x128xf32>
    %36 = vector.broadcast %9 : vector<1x128xf32> to vector<16x128xf32>
    %37 = arith.addf %35, %36 : vector<16x128xf32>
    %38 = arith.truncf %37 : vector<16x128xf32> to vector<16x128xbf16>
    %c0_12 = arith.constant 0 : index
    %c0_13 = arith.constant 0 : index
    %c0_14 = arith.constant 0 : index
    %39 = vector.load %arg5[%c0_12, %c0_13, %c0_14] : memref<1x768x128xbf16, #tpu.memory_space<vmem>>, vector<1x768x128xbf16>
    %40 = vector.shape_cast %39 : vector<1x768x128xbf16> to vector<768x128xbf16>
    "tpu.trace_start"() <{level = 10 : i32, message = "ed,nd->en"}> : () -> ()
    %cst_15 = arith.constant dense<0.000000e+00> : vector<768x16xf32>
    %41 = tpu.matmul %40, %38, %cst_15 {dimension_numbers = #tpu.dot_dimension_numbers<[1], [1], [0], [0], [0, 0, 1, 0], [], []>} : vector<768x128xbf16>, vector<16x128xbf16>, vector<768x16xf32> -> vector<768x16xf32>
    "tpu.trace_stop"() : () -> ()
    %42 = vector.shape_cast %41 : vector<768x16xf32> to vector<3x4x64x16xf32>
    %43 = vector.extract_strided_slice %42 {offsets = [0, 0, 0, 0], sizes = [1, 4, 64, 16], strides = [1, 1, 1, 1]} : vector<3x4x64x16xf32> to vector<1x4x64x16xf32>
    %44 = vector.shape_cast %43 : vector<1x4x64x16xf32> to vector<4x64x16xf32>
    %45 = tpu.transpose %44, [0, 2, 1] : vector<4x64x16xf32> -> vector<4x16x64xf32>
    %46 = arith.truncf %45 : vector<4x16x64xf32> to vector<4x16x64xbf16>
    %47 = vector.extract_strided_slice %42 {offsets = [1, 0, 0, 0], sizes = [1, 4, 64, 16], strides = [1, 1, 1, 1]} : vector<3x4x64x16xf32> to vector<1x4x64x16xf32>
    %48 = vector.shape_cast %47 : vector<1x4x64x16xf32> to vector<4x64x16xf32>
    %49 = arith.truncf %48 : vector<4x64x16xf32> to vector<4x64x16xbf16>
    %50 = vector.extract_strided_slice %42 {offsets = [2, 0, 0, 0], sizes = [1, 4, 64, 16], strides = [1, 1, 1, 1]} : vector<3x4x64x16xf32> to vector<1x4x64x16xf32>
    %51 = vector.shape_cast %50 : vector<1x4x64x16xf32> to vector<4x64x16xf32>
    %52 = arith.truncf %51 : vector<4x64x16xf32> to vector<4x64x16xbf16>
    "tpu.trace_start"() <{level = 10 : i32, message = "hnd,hdm->hnm"}> : () -> ()
    %cst_16 = arith.constant dense<0.000000e+00> : vector<4x16x16xf32>
    %53 = tpu.matmul %46, %49, %cst_16 {dimension_numbers = #tpu.dot_dimension_numbers<[2], [1], [1], [2], [0, 0, 0, 1, 1, 2], [0], [0]>} : vector<4x16x64xbf16>, vector<4x64x16xbf16>, vector<4x16x16xf32> -> vector<4x16x16xf32>
    "tpu.trace_stop"() : () -> ()
    %cst_17 = arith.constant dense<0xFF800000> : vector<4x16xf32>
    %54 = vector.multi_reduction <maximumf>, %53, %cst_17 [2] : vector<4x16x16xf32> to vector<4x16xf32>
    %55 = vector.shape_cast %54 : vector<4x16xf32> to vector<4x16x1xf32>
    %56 = vector.broadcast %55 : vector<4x16x1xf32> to vector<4x16x16xf32>
    %57 = arith.subf %53, %56 : vector<4x16x16xf32>
    %58 = math.exp %57 : vector<4x16x16xf32>
    %cst_18 = arith.constant dense<0.000000e+00> : vector<4x16xf32>
    %59 = vector.multi_reduction <add>, %58, %cst_18 [2] : vector<4x16x16xf32> to vector<4x16xf32>
    %60 = vector.shape_cast %59 : vector<4x16xf32> to vector<4x16x1xf32>
    %61 = arith.truncf %58 : vector<4x16x16xf32> to vector<4x16x16xbf16>
    "tpu.trace_start"() <{level = 10 : i32, message = "hnm,hdm->hnd"}> : () -> ()
    %cst_19 = arith.constant dense<0.000000e+00> : vector<4x16x64xf32>
    %62 = tpu.matmul %61, %52, %cst_19 {dimension_numbers = #tpu.dot_dimension_numbers<[2], [2], [1], [1], [0, 0, 0, 1, 1, 1], [0], [0]>} : vector<4x16x16xbf16>, vector<4x64x16xbf16>, vector<4x16x64xf32> -> vector<4x16x64xf32>
    "tpu.trace_stop"() : () -> ()
    %63 = tpu.reciprocal %60 {approx = true} : vector<4x16x1xf32> -> vector<4x16x1xf32>
    %64 = vector.broadcast %63 : vector<4x16x1xf32> to vector<4x16x64xf32>
    %65 = arith.mulf %62, %64 : vector<4x16x64xf32>
    %66 = arith.truncf %65 : vector<4x16x64xf32> to vector<4x16x64xbf16>
    %c0_20 = arith.constant 0 : index
    %c0_21 = arith.constant 0 : index
    %c0_22 = arith.constant 0 : index
    %c0_23 = arith.constant 0 : index
    %67 = vector.load %arg6[%c0_20, %c0_21, %c0_22, %c0_23] : memref<1x4x64x128xbf16, #tpu.memory_space<vmem>>, vector<1x4x64x128xbf16>
    %68 = vector.shape_cast %67 : vector<1x4x64x128xbf16> to vector<4x64x128xbf16>
    "tpu.trace_start"() <{level = 10 : i32, message = "hnd,hdk->hnk"}> : () -> ()
    %cst_24 = arith.constant dense<0.000000e+00> : vector<4x16x128xf32>
    %69 = tpu.matmul %66, %68, %cst_24 {dimension_numbers = #tpu.dot_dimension_numbers<[2], [1], [1], [2], [0, 0, 0, 1, 1, 2], [0], [0]>} : vector<4x16x64xbf16>, vector<4x64x128xbf16>, vector<4x16x128xf32> -> vector<4x16x128xf32>
    "tpu.trace_stop"() : () -> ()
    %cst_25 = arith.constant dense<0.000000e+00> : vector<16x128xf32>
    %70 = vector.multi_reduction <add>, %69, %cst_25 [0] : vector<4x16x128xf32> to vector<16x128xf32>
    %71 = arith.addf %5, %70 : vector<16x128xf32>
    %72 = vector.broadcast %10 : vector<1x128xf32> to vector<16x128xf32>
    %73 = arith.addf %71, %72 : vector<16x128xf32>
    %cst_26 = arith.constant dense<0.000000e+00> : vector<16xf32>
    %74 = vector.multi_reduction <add>, %73, %cst_26 [1] : vector<16x128xf32> to vector<16xf32>
    %75 = vector.shape_cast %74 : vector<16xf32> to vector<16x1xf32>
    %cst_27 = arith.constant 1.280000e+02 : f32
    %76 = vector.broadcast %cst_27 : f32 to vector<16x1xf32>
    %77 = arith.divf %75, %76 : vector<16x1xf32>
    %78 = vector.broadcast %77 : vector<16x1xf32> to vector<16x128xf32>
    %79 = arith.subf %73, %78 : vector<16x128xf32>
    %80 = arith.mulf %79, %79 : vector<16x128xf32>
    %cst_28 = arith.constant dense<0.000000e+00> : vector<16xf32>
    %81 = vector.multi_reduction <add>, %80, %cst_28 [1] : vector<16x128xf32> to vector<16xf32>
    %82 = vector.shape_cast %81 : vector<16xf32> to vector<16x1xf32>
    %cst_29 = arith.constant 1.280000e+02 : f32
    %83 = vector.broadcast %cst_29 : f32 to vector<16x1xf32>
    %84 = arith.divf %82, %83 : vector<16x1xf32>
    %85 = vector.broadcast %77 : vector<16x1xf32> to vector<16x128xf32>
    %86 = arith.subf %73, %85 : vector<16x128xf32>
    %cst_30 = arith.constant 9.99999974E-6 : f32
    %87 = vector.broadcast %cst_30 : f32 to vector<16x1xf32>
    %88 = arith.addf %84, %87 : vector<16x1xf32>
    %89 = math.rsqrt %88 : vector<16x1xf32>
    %90 = vector.broadcast %89 : vector<16x1xf32> to vector<16x128xf32>
    %91 = arith.mulf %86, %90 : vector<16x128xf32>
    %92 = vector.broadcast %11 : vector<1x128xf32> to vector<16x128xf32>
    %93 = arith.mulf %91, %92 : vector<16x128xf32>
    %94 = vector.broadcast %12 : vector<1x128xf32> to vector<16x128xf32>
    %95 = arith.addf %93, %94 : vector<16x128xf32>
    %96 = arith.truncf %95 : vector<16x128xf32> to vector<16x128xbf16>
    %c0_31 = arith.constant 0 : index
    %c0_32 = arith.constant 0 : index
    %c0_33 = arith.constant 0 : index
    %97 = vector.load %arg7[%c0_31, %c0_32, %c0_33] : memref<1x128x256xbf16, #tpu.memory_space<vmem>>, vector<1x128x256xbf16>
    %98 = vector.shape_cast %97 : vector<1x128x256xbf16> to vector<128x256xbf16>
    %cst_34 = arith.constant dense<0.000000e+00> : vector<16x256xf32>
    %99 = tpu.matmul %96, %98, %cst_34 {dimension_numbers = #tpu.dot_dimension_numbers<[1], [0], [0], [1], [0, 0, 1, 1], [], []>} : vector<16x128xbf16>, vector<128x256xbf16>, vector<16x256xf32> -> vector<16x256xf32>
    %100 = vector.broadcast %15 : vector<1x256xf32> to vector<16x256xf32>
    %101 = arith.addf %99, %100 : vector<16x256xf32>
    %cst_35 = arith.constant 5.000000e-01 : f32
    %102 = vector.broadcast %cst_35 : f32 to vector<16x256xf32>
    %103 = arith.mulf %102, %101 : vector<16x256xf32>
    %cst_36 = arith.constant 0.707106769 : f32
    %104 = vector.broadcast %cst_36 : f32 to vector<16x256xf32>
    %105 = arith.mulf %101, %104 : vector<16x256xf32>
    %106 = math.erf %105 : vector<16x256xf32>
    %cst_37 = arith.constant 1.000000e+00 : f32
    %107 = vector.broadcast %cst_37 : f32 to vector<16x256xf32>
    %108 = arith.addf %107, %106 : vector<16x256xf32>
    %109 = arith.mulf %103, %108 : vector<16x256xf32>
    %110 = arith.truncf %109 : vector<16x256xf32> to vector<16x256xbf16>
    %c0_38 = arith.constant 0 : index
    %c0_39 = arith.constant 0 : index
    %c0_40 = arith.constant 0 : index
    %111 = vector.load %arg8[%c0_38, %c0_39, %c0_40] : memref<1x256x128xbf16, #tpu.memory_space<vmem>>, vector<1x256x128xbf16>
    %112 = vector.shape_cast %111 : vector<1x256x128xbf16> to vector<256x128xbf16>
    %cst_41 = arith.constant dense<0.000000e+00> : vector<16x128xf32>
    %113 = tpu.matmul %110, %112, %cst_41 {dimension_numbers = #tpu.dot_dimension_numbers<[1], [0], [0], [1], [0, 0, 1, 1], [], []>} : vector<16x256xbf16>, vector<256x128xbf16>, vector<16x128xf32> -> vector<16x128xf32>
    %114 = vector.broadcast %13 : vector<1x128xf32> to vector<16x128xf32>
    %115 = arith.addf %113, %114 : vector<16x128xf32>
    %116 = arith.addf %73, %115 : vector<16x128xf32>
    %117 = arith.index_cast %arg1 : i32 to index
    %c0_42 = arith.constant 0 : index
    %c0_43 = arith.constant 0 : index
    %118 = vector.load %arg9[%117, %c0_42, %c0_43] : memref<2x16x128xf32, #tpu.memory_space<vmem>>, vector<1x16x128xf32>
    %119 = vector.shape_cast %118 : vector<1x16x128xf32> to vector<16x128xf32>
    %120 = vector.shape_cast %116 : vector<16x128xf32> to vector<1x16x128xf32>
    tpu.vector_store %arg9[%117, %c0_42, %c0_43], %120 {strides = array<i32>} : memref<2x16x128xf32, #tpu.memory_space<vmem>>, vector<1x16x128xf32>,
    return
  }
  func.func @transform_0(%arg0: i32, %arg1: i32) -> (i32, i32, i32) {
    %c0_i32 = arith.constant 0 : i32
    %0 = arith.cmpi eq, %arg0, %c0_i32 : i32
    %c0_i32_0 = arith.constant 0 : i32
    %1 = arith.select %0, %arg1, %c0_i32_0 : i32
    %c0_i32_1 = arith.constant 0 : i32
    %c0_i32_2 = arith.constant 0 : i32
    %c0_i32_3 = arith.constant 0 : i32
    return %1, %c0_i32_1, %c0_i32_2 : i32, i32, i32
  }
  func.func @transform_1(%arg0: i32, %arg1: i32) -> (i32, i32, i32) {
    %c0_i32 = arith.constant 0 : i32
    %c0_i32_0 = arith.constant 0 : i32
    %c0_i32_1 = arith.constant 0 : i32
    return %arg0, %c0_i32, %c0_i32_0 : i32, i32, i32
  }
  func.func @transform_2(%arg0: i32, %arg1: i32) -> (i32, i32, i32) {
    %c0_i32 = arith.constant 0 : i32
    %c0_i32_0 = arith.constant 0 : i32
    %c0_i32_1 = arith.constant 0 : i32
    return %arg0, %c0_i32, %c0_i32_0 : i32, i32, i32
  }
  func.func @transform_3(%arg0: i32, %arg1: i32) -> (i32, i32, i32) {
    %c0_i32 = arith.constant 0 : i32
    %c0_i32_0 = arith.constant 0 : i32
    %c0_i32_1 = arith.constant 0 : i32
    return %arg0, %c0_i32, %c0_i32_0 : i32, i32, i32
  }
  func.func @transform_4(%arg0: i32, %arg1: i32) -> (i32, i32, i32, i32) {
    %c0_i32 = arith.constant 0 : i32
    %c0_i32_0 = arith.constant 0 : i32
    %c0_i32_1 = arith.constant 0 : i32
    %c0_i32_2 = arith.constant 0 : i32
    return %arg0, %c0_i32, %c0_i32_0, %c0_i32_1 : i32, i32, i32, i32
  }
  func.func @transform_5(%arg0: i32, %arg1: i32) -> (i32, i32, i32) {
    %c0_i32 = arith.constant 0 : i32
    %c0_i32_0 = arith.constant 0 : i32
    %c0_i32_1 = arith.constant 0 : i32
    return %arg0, %c0_i32, %c0_i32_0 : i32, i32, i32
  }
  func.func @transform_6(%arg0: i32, %arg1: i32) -> (i32, i32, i32) {
    %c0_i32 = arith.constant 0 : i32
    %c0_i32_0 = arith.constant 0 : i32
    %c0_i32_1 = arith.constant 0 : i32
    return %arg0, %c0_i32, %c0_i32_0 : i32, i32, i32
  }
  func.func @transform_7(%arg0: i32, %arg1: i32) -> (i32, i32, i32) {
    %c0_i32 = arith.constant 0 : i32
    %c0_i32_0 = arith.constant 0 : i32
    %c0_i32_1 = arith.constant 0 : i32
    %c0_i32_2 = arith.constant 0 : i32
    return %c0_i32, %c0_i32_0, %c0_i32_1 : i32, i32, i32
  }
}

</mosaic_0001>

<bundles_post_ra>
// kernel: tpu_custom_call.1
= control target key start
LH: loop header
LB: loop body
LE: loop exit
PB: predicated region body
PF: predicated region fallthrough
CT: control target
= control target key end

     0   :  { %s4972_s0 = inlined_call_operand.hbm [shape: f32[2,16,128], index: 0, kind: input, shape index: {}]   ;;  %s4973_s1 = inlined_call_operand.hbm [shape: f32[2,8,128], index: 1, kind: input, shape index: {}]   ;;  %s4974_s2 = inlined_call_operand.vmem [shape: f32[2,1,256], index: 2, kind: input, shape index: {}]   ;;  %s4975_s3 = inlined_call_operand.hbm [shape: bf16[2,768,128], index: 3, kind: input, shape index: {}]   ;;  %s4976_s4 = inlined_call_operand.hbm [shape: bf16[2,4,64,128], index: 4, kind: input, shape index: {}]   ;;  %s4977_s5 = inlined_call_operand.hbm [shape: bf16[2,128,256], index: 5, kind: input, shape index: {}]   ;;  %s4978_s6 = inlined_call_operand.hbm [shape: bf16[2,256,128], index: 6, kind: input, shape index: {}]   ;;  %s4979_s7 = inlined_call_operand.hbm [shape: f32[2,16,128], index: 7, kind: output, shape index: {}]  }
   0x1   :  { %5006 = sst [smem:[#allocation29_spill]] %s4972_s0 }
   0x2   :  { %5007 = sst [smem:[#allocation30_spill]] %s4973_s1 }
   0x3   :  { %5008 = sst [smem:[#allocation31_spill]] %s4974_s2 }
   0x4   :  { %5009 = sst [smem:[#allocation32_spill]] %s4976_s4 }
   0x5   :  { %5010 = sst [smem:[#allocation33_spill]] %s4978_s6 }
   0x6   :  { %5011 = sst [smem:[#allocation34_spill]] %s4979_s7 }
   0x7   :  { %12 = vsyncpa [#allocation3], 0 }
   0x8   :  { %14 = vsyncpa [#allocation3 + $0x1], 0 }
   0x9   :  { %15 = vsyncpa [#allocation6], 0 }
   0xa   :  { %17 = vsyncpa [#allocation6 + $0x1], 0 }
   0xb   :  { %18 = vsyncpa [#allocation9], 0 }
   0xc   :  { %20 = vsyncpa [#allocation9 + $0x1], 0 }
   0xd   :  { %21 = vsyncpa [#allocation12], 0 }
   0xe   :  { %23 = vsyncpa [#allocation12 + $0x1], 0 }
   0xf   :  { %24 = vsyncpa [#allocation4], 0  ;;  %s4108_s24 = smov 0   ;;  %s4110_s25 = smov 0  }
  0x10   :  { %s4112_s26 = smov 0   ;;  %s4114_s27 = smov 0  }
  0x11   :  { %s4116_s28 = smov 0   ;;  %s4118_s29 = smov 0  }
  0x12   :  { %s4120_s30 = smov 0   ;;  %s4122_s8 = smov 0  }
  0x13   :  { %s4124_s9 = smov 0   ;;  %s4126_s10 = smov 0  }
  0x14   :  { %s4128_s11 = smov 0  }
  0x15 LB: > { %5012 = sst [smem:[#allocation19_spill]] %s4014_s25  ;;  %s4162_s12 = sadd.s32 4294967295, %s4050_s11   ;;  %s4050_s11 = sphi %s4128_s11, %s30_s11   ;;  %s4046_s10 = sphi %s4126_s10, %s5071_s10   ;;  %s4042_s9 = sphi %s4124_s9, %s5070_s9   ;;  %s4038_s8 = sphi %s4122_s8, %s5069_s8   ;;  %s4034_s30 = sphi %s4120_s30, %s5068_s30   ;;  %s4030_s29 = sphi %s4118_s29, %s5067_s29   ;;  %s4026_s28 = sphi %s4116_s28, %s5066_s28   ;;  %s4022_s27 = sphi %s4114_s27, %s5065_s27   ;;  %s4018_s26 = sphi %s4112_s26, %s5064_s26   ;;  %s4014_s25 = sphi %s4110_s25, %s5063_s25   ;;  %s4010_s24 = sphi %s4108_s24, %s5058_s24  }
  0x16   : > { %5013 = sst [smem:[#allocation20_spill]] %s4026_s28  ;;  %p4984_p0 = scmp.eq.s32.totalorder %s4050_s11, 0 }
  0x17   : > { %5014 = sst [smem:[#allocation21_spill]] %s4034_s30  ;;  %p4982_p1 = scmp.eq.s32.totalorder %s4162_s12, 0 }
  0x18   : > { %5015 = sst [smem:[#allocation22_spill]] %s4038_s8  ;;  %p86_p2 = scmp.ne.s32.totalorder %s4018_s26, %s4014_s25 }
  0x19   : > { %5016 = sst [smem:[#allocation23_spill]] %s4042_s9  ;;  %p92_p3 = scmp.ne.s32.totalorder %s4014_s25, %s4010_s24 }
  0x1a   : > { %5017 = sst [smem:[#allocation24_spill]] %s4162_s12  ;;  %p4981_p4 = scmp.lt.s32.totalorder %s4050_s11, 4 }
  0x1b   : > { %p88_p5 = por %p86_p2, %p4984_p0  ;;  %p4175_p6 = por %p92_p3, %p4982_p1 }
  0x1c   : > { %s4983_s15 = sand.u32 1, %s4050_s11   ;;  %s4181_s16 = sand.u32 1, %s4018_s26  }
  0x1d   : > { %s5018_s14 = scalar_select %p4175_p6, 1, 0 }
  0x1e   : > { %s2933_s17 = sshll.u32 %s4181_s16, 3  ;;  %s2934_s18 = sshll.u32 %s4046_s10, 7 }
  0x1f   : > { %5019 = sst [smem:[#allocation25_spill]] %s5018_s14  ;;  %s5020_s1 = sld [smem:[#allocation30_spill]] }
  0x20   : > { %s294_s22 = scalar_lea.vmem [#allocation5], %s2933_s17  ;;  %p4194_p7 = pnand %p4981_p4, %p88_p5 }
  0x21   : > { %s301_s23 = sshll.u32 %s294_s22, 4  ;;  %s4202_s19 = scalar_lea.sflag [#allocation6], %s4983_s15  ;;  %s4190_s23 = int_to_ptr.vmem [resolvable:$true] %s301_s23 }
  0x22   : > { %s5021_s24 = scalar_select %p4194_p7, 1, 0 }
  0x23   : > { %p4208_p10 = pneg %p4194_p7 }
  0x25   : > { %s4188_s21 = scalar_lea.hbm %s5020_s1, %s2934_s18  ;;  %s3743_s7 = scalar_lea.hbm %s5020_s1, 256 }
  0x26   : > { %s3738_s18 = scalar_lea.hbm %s4188_s21, 128  ;;  %p3744_p13 = scmp.lt.u32.totalorder %s4188_s21, %s5020_s1 }
  0x27   : > { %p3739_p9 = scmp.ne.s32.totalorder %s4188_s21, %s3738_s18  ;;  %p3745_p2 = scmp.lt.u32.totalorder %s3743_s7, %s3738_s18 }
  0x28   : > { %p3747_p5 = scmp.lt.u32.totalorder %s3738_s18, %s4188_s21 }
  0x29   : > { %p3741_p11 = pnand %p4208_p10, %p3739_p9  ;;  %p3746_p3 = por %p3745_p2, %p3744_p13 }
  0x2b   : > { %p3742_p12 = pneg %p3741_p11  ;;  %p3748_p4 = por %p3747_p5, %p3746_p3 }
  0x2d   : > { %p3749_p1 = pnand %p3748_p4, %p3742_p12 }
  0x2f   : > { %3752 = shalt.err (!%p3749_p1)
}
  0x30   : > { %s3753_s15 = scalar_lea.vmem %s4190_s23, 128  ;;  %s4052_s20 = smov [#allocation5]  }
  0x31   : > { %p3754_p9 = scmp.ne.s32.totalorder %s4190_s23, %s3753_s15  ;;  %s3758_s22 = sshll.u32 %s4052_s20, 4  ;;  %s3759_s22 = int_to_ptr.vmem [resolvable:$false] %s3758_s22 }
  0x32   : > { %s3760_s30 = scalar_lea.vmem %s3759_s22, 256  ;;  %p3761_p8 = scmp.lt.s32.totalorder %s4190_s23, %s3759_s22 }
  0x33   : > { %p3756_p11 = pnand %p3754_p9, %p4208_p10  ;;  %p3762_p6 = scmp.lt.s32.totalorder %s3760_s30, %s3753_s15 }
  0x35   : > { %p3757_p0 = pneg %p3756_p11  ;;  %p3763_p13 = por %p3762_p6, %p3761_p8 }
  0x37   : > { %p3764_p2 = pnand %p3763_p13, %p3757_p0 }
  0x39   : > { %3767 = shalt.err (!%p3764_p2)
}
  0x3a   : > { %3469 = dma.hbm_to_vmem [thread:$0]  (!%p4194_p7), %s4188_s21, 128, %s4190_s23, %s4202_s19  }
  0x3b   : > { %p397_p1 = scmp.lt.s32.totalorder %s4050_s11, 5  ;;  %s4234_s7 = sshll.u32 %s4181_s16, 7 }
  0x3c   : > { %p5023_p4 = scmp.ge.s32.totalorder %s4050_s11, 1  ;;  %s4243_s15 = sshll.u32 %s4046_s10, 11 }
  0x3d   : > { %s340_s18 = scalar_lea.vmem [#allocation8], %s4234_s7  ;;  %s5026_s4 = sld [smem:[#allocation32_spill]] }
  0x3e   : > { %p4238_p6 = pnand %p5023_p4, %p397_p1  ;;  %s347_s20 = sshll.u32 %s340_s18, 4  ;;  %s4252_s20 = int_to_ptr.vmem [resolvable:$true] %s347_s20 }
  0x3f   : > { %s5027_s21 = sand.u32 1, %s4050_s11  }
  0x40   : > { %s5024_s13 = scalar_select %p4238_p6, 1, 0 }
  0x41   : > { %s4256_s23 = scalar_lea.sflag [#allocation9], %s5027_s21 }
  0x42   : > { %5025 = sst [smem:[#allocation26_spill]] %s5024_s13 }
  0x43   : > { %s4250_s1 = scalar_lea.hbm %s5026_s4, %s4243_s15  ;;  %s3773_s22 = scalar_lea.hbm %s5026_s4, 4096 }
  0x44   : > { %s3768_s2 = scalar_lea.hbm %s4250_s1, 2048  ;;  %p3774_p3 = scmp.lt.u32.totalorder %s4250_s1, %s5026_s4 }
  0x45   : > { %p3769_p0 = scmp.ne.s32.totalorder %s4250_s1, %s3768_s2  ;;  %p3775_p5 = scmp.lt.u32.totalorder %s3773_s22, %s3768_s2 }
  0x46   : > { %p3777_p11 = scmp.lt.u32.totalorder %s3768_s2, %s4250_s1 }
  0x47   : > { %p3771_p8 = pnand %p3769_p0, %p4208_p10  ;;  %p3776_p9 = por %p3775_p5, %p3774_p3 }
  0x49   : > { %p3772_p12 = pneg %p3771_p8  ;;  %p3778_p13 = por %p3777_p11, %p3776_p9 }
  0x4b   : > { %p3779_p2 = pnand %p3778_p13, %p3772_p12 }
  0x4d   : > { %3782 = shalt.err (!%p3779_p2)
}
  0x4e   : > { %s3783_s21 = scalar_lea.vmem %s4252_s20, 2048  ;;  %s4053_s8 = smov [#allocation8]  }
  0x4f   : > { %p3784_p1 = scmp.ne.s32.totalorder %s4252_s20, %s3783_s21  ;;  %s3788_s18 = sshll.u32 %s4053_s8, 4  ;;  %s3789_s18 = int_to_ptr.vmem [resolvable:$false] %s3788_s18 }
  0x50   : > { %s3790_s14 = scalar_lea.vmem %s3789_s18, 4096  ;;  %p3791_p8 = scmp.lt.s32.totalorder %s4252_s20, %s3789_s18 }
  0x51   : > { %p3786_p4 = pnand %p3784_p1, %p4208_p10  ;;  %p3792_p6 = scmp.lt.s32.totalorder %s3790_s14, %s3783_s21 }
  0x53   : > { %p3787_p0 = pneg %p3786_p4  ;;  %p3793_p3 = por %p3792_p6, %p3791_p8 }
  0x55   : > { %p3794_p5 = pnand %p3793_p3, %p3787_p0 }
  0x57   : > { %3797 = shalt.err (!%p3794_p5)
}
  0x58   : > { %s4989_s2 = smov 64   ;;  %s4991_s22 = smov 4  }
  0x59   : > { %3475 = dma.hbm_to_vmem [thread:$0]  (!%p4194_p7), %s4250_s1, 2048, %s4252_s20, %s4256_s23, %s4989_s2, %s4989_s2, %s4991_s22  }
  0x5a   : > { %s39_s30 = sadd.s32 1, %s4042_s9  ;;  %s42_s21 = sadd.s32 1, %s4046_s10 }
  0x5b   : > { %p40_p6 = scmp.ge.s32.totalorder %s39_s30, 2  ;;  %p46_p12 = scmp.eq.s32.totalorder %s4046_s10, 0 }
  0x5c   : > { %s53_s8 = sadd.s32 1, %s4030_s29  ;;  %p60_p9 = scmp.ne.s32.totalorder %s4030_s29, %s4026_s28 }
  0x5d   : > { %s5073_s30 = smov (%p40_p6, %s39_s30), 0  ;;  %s5075_s21 = smov (!%p40_p6, %s42_s21), %s4046_s10 }
  0x5e   : > { %s47_s18 = scalar_select %p46_p12, %s4042_s9, 0 }
  0x5f   : > { %p44_p11 = scmp.ge.s32.totalorder %s5075_s21, 2  ;;  %p5028_p13 = scmp.eq.s32.totalorder %s4050_s11, 0 }
  0x60   : > { %p66_p1 = scmp.ne.s32.totalorder %s4026_s28, %s4022_s27  ;;  %s267_s1 = sand.u32 1, %s4030_s29  }
  0x61   : > { %p4295_p2 = por %p5028_p13, %p60_p9  ;;  %s5077_s21 = smov (%p44_p11, %s5075_s21), 0 }
  0x62   : > { %5030 = sst [smem:[#allocation27_spill]] %s5077_s21  ;;  %p5031_p4 = scmp.eq.s32.totalorder %s4162_s12, 0 }
  0x63   : > { %p48_p8 = scmp.eq.s32.totalorder %s5077_s21, 0  ;;  %s76_s2 = ssub.s32 %s4046_s10, %s5077_s21 }
  0x64   : > { %p4306_p0 = por %p5031_p4, %p66_p1  ;;  %p77_p3 = scmp.eq.s32.totalorder %s76_s2, 0 }
  0x65   : > { %s2930_s22 = sshll.u32 %s267_s1, 4  ;;  %s5034_s9 = sadd.s32 1, %s4018_s26 }
  0x66   : > { %s5032_s20 = scalar_select %p4306_p0, 1, 0 }
  0x67   : > { %s49_s4 = scalar_select %p48_p8, %s5073_s30, 0 }
  0x68   : > { %5033 = sst [smem:[#allocation28_spill]] %s5032_s20  ;;  %s3067_s28 = sshll.u32 %s47_s18, 8 }
  0x69   : > { %s4317_s27 = scalar_select %p77_p3, %s4018_s26, %s5034_s9  }
  0x6a   : > { %s50_s25 = ssub.s32 %s47_s18, %s49_s4  ;;  %s5035_s0 = sld [smem:[#allocation29_spill]] }
  0x6b   : > { %p51_p5 = scmp.eq.s32.totalorder %s50_s25, 0  ;;  %s271_s20 = scalar_lea.vmem [#allocation2], %s2930_s22 }
  0x6c   : > { %s280_s21 = sshll.u32 %s271_s20, 4  ;;  %p5036_p6 = scmp.lt.s32.totalorder %s4050_s11, 4  ;;  %s4327_s21 = int_to_ptr.vmem [resolvable:$true] %s280_s21 }
  0x6d   : > { %s4325_s2 = scalar_select %p51_p5, %s4030_s29, %s53_s8  }
  0x6e   : > { %p4333_p12 = pnand %p5036_p6, %p4295_p2  ;;  %s4337_s25 = scalar_lea.sflag [#allocation3], %s267_s1 }
  0x70   : > { %s4322_s6 = scalar_lea.hbm %s5035_s0, %s3067_s28  ;;  %p3800_p11 = pneg %p4333_p12 }
  0x71   : > { %s3798_s28 = scalar_lea.hbm %s4322_s6, 256  ;;  %s3803_s13 = scalar_lea.hbm %s5035_s0, 512 }
  0x72   : > { %p3799_p9 = scmp.ne.s32.totalorder %s4322_s6, %s3798_s28  ;;  %p3804_p2 = scmp.lt.u32.totalorder %s4322_s6, %s5035_s0 }
  0x73   : > { %p3805_p4 = scmp.lt.u32.totalorder %s3803_s13, %s3798_s28  ;;  %p3807_p3 = scmp.lt.u32.totalorder %s3798_s28, %s4322_s6 }
  0x74   : > { %p3801_p13 = pnand %p3800_p11, %p3799_p9 }
  0x75   : > { %p3806_p8 = por %p3805_p4, %p3804_p2 }
  0x76   : > { %p3802_p1 = pneg %p3801_p13 }
  0x77   : > { %p3808_p5 = por %p3807_p3, %p3806_p8 }
  0x79   : > { %p3809_p6 = pnand %p3808_p5, %p3802_p1 }
  0x7b   : > { %3812 = shalt.err (!%p3809_p6)
}
  0x7c   : > { %s3813_s18 = scalar_lea.vmem %s4327_s21, 256  ;;  %s4056_s14 = smov [#allocation2]  }
  0x7d   : > { %p3814_p9 = scmp.ne.s32.totalorder %s4327_s21, %s3813_s18  ;;  %s3818_s1 = sshll.u32 %s4056_s14, 4  ;;  %s3819_s1 = int_to_ptr.vmem [resolvable:$false] %s3818_s1 }
  0x7e   : > { %s3820_s20 = scalar_lea.vmem %s3819_s1, 512  ;;  %p3821_p7 = scmp.lt.s32.totalorder %s4327_s21, %s3819_s1 }
  0x7f   : > { %p3816_p13 = pnand %p3814_p9, %p3800_p11  ;;  %p3822_p2 = scmp.lt.s32.totalorder %s3820_s20, %s3813_s18 }
  0x81   : > { %p3817_p0 = pneg %p3816_p13  ;;  %p3823_p4 = por %p3822_p2, %p3821_p7 }
  0x83   : > { %p3824_p8 = pnand %p3823_p4, %p3817_p0 }
  0x85   : > { %3827 = shalt.err (!%p3824_p8)
}
  0x86   : > { %s4057_s28 = smov 128   ;;  %s4058_s9 = smov 8  }
  0x87   : > { %3466 = dma.hbm_to_vmem [thread:$0]  (!%p4333_p12), %s4322_s6, 256, %s4327_s21, %s4337_s25, %s4057_s28, %s4057_s28, %s4058_s9  }
  0x88   : > { %s3445_s12 = smul.u32 6144, %s4046_s10  ;;  %s4382_s4 = scalar_lea.hbm %s4977_s5, %s4243_s15 }
  0x89   : > { %s5038_s13 = smul.u32 384, %s4181_s16 }
  0x8a   : > { %s4376_s1 = scalar_lea.hbm %s4975_s3, %s3445_s12 }
  0x8b   : > { %s319_s22 = scalar_lea.vmem [#allocation7], %s5038_s13  ;;  %s3828_s6 = scalar_lea.hbm %s4376_s1, 6144 }
  0x8c   : > { %s326_s8 = sshll.u32 %s319_s22, 4  ;;  %p3829_p7 = scmp.ne.s32.totalorder %s4376_s1, %s3828_s6  ;;  %s4371_s8 = int_to_ptr.vmem [resolvable:$true] %s326_s8 }
  0x8d   : > { %s3833_s13 = scalar_lea.hbm %s4975_s3, 12288  ;;  %p3834_p11 = scmp.lt.u32.totalorder %s4376_s1, %s4975_s3 }
  0x8e   : > { %p3831_p0 = pnand %p3829_p7, %p4208_p10  ;;  %p3835_p1 = scmp.lt.u32.totalorder %s3833_s13, %s3828_s6 }
  0x8f   : > { %p3837_p5 = scmp.lt.u32.totalorder %s3828_s6, %s4376_s1 }
  0x90   : > { %p3832_p12 = pneg %p3831_p0  ;;  %p3836_p3 = por %p3835_p1, %p3834_p11 }
  0x92   : > { %p3838_p6 = por %p3837_p5, %p3836_p3 }
  0x94   : > { %p3839_p9 = pnand %p3838_p6, %p3832_p12 }
  0x96   : > { %3842 = shalt.err (!%p3839_p9)
}
  0x97   : > { %s3843_s0 = scalar_lea.vmem %s4371_s8, 6144  ;;  %s4059_s18 = smov [#allocation7]  }
  0x98   : > { %p3844_p13 = scmp.ne.s32.totalorder %s4371_s8, %s3843_s0  ;;  %s3848_s14 = sshll.u32 %s4059_s18, 4  ;;  %s3849_s14 = int_to_ptr.vmem [resolvable:$false] %s3848_s14 }
  0x99   : > { %s3850_s20 = scalar_lea.vmem %s3849_s14, 12288  ;;  %p3851_p8 = scmp.lt.s32.totalorder %s4371_s8, %s3849_s14 }
  0x9a   : > { %p3846_p2 = pnand %p3844_p13, %p4208_p10  ;;  %p3852_p7 = scmp.lt.s32.totalorder %s3850_s20, %s3843_s0 }
  0x9c   : > { %p3847_p4 = pneg %p3846_p2  ;;  %p3853_p0 = por %p3852_p7, %p3851_p8 }
  0x9e   : > { %p3854_p11 = pnand %p3853_p0, %p3847_p4 }
  0xa0   : > { %3857 = shalt.err (!%p3854_p11)
}
  0xa1   : > { %p5039_p12 = scmp.ne.s32.totalorder %s5021_s24, 0  ;;  %s5040_s6 = smov 4  }
  0xa2   : > { %s5041_s21 = smov 64   ;;  %s361_s25 = scalar_lea.vmem [#allocation10], %s4234_s7 }
  0xa3   : > { %3472 = dma.hbm_to_vmem [thread:$0]  (!%p5039_p12), %s4376_s1, 6144, %s4371_s8, %s4202_s19, %s5041_s21, %s5041_s21, %s5040_s6  }
  0xa4   : > { %s368_s13 = sshll.u32 %s361_s25, 4  ;;  %s3858_s12 = scalar_lea.hbm %s4382_s4, 2048  ;;  %s4410_s13 = int_to_ptr.vmem [resolvable:$true] %s368_s13 }
  0xa5   : > { %p3859_p1 = scmp.ne.s32.totalorder %s4382_s4, %s3858_s12  ;;  %s3863_s18 = scalar_lea.hbm %s4977_s5, 4096 }
  0xa6   : > { %p3864_p6 = scmp.lt.u32.totalorder %s4382_s4, %s4977_s5  ;;  %p3865_p9 = scmp.lt.u32.totalorder %s3863_s18, %s3858_s12 }
  0xa7   : > { %p3861_p3 = pnand %p3859_p1, %p4208_p10  ;;  %p3867_p2 = scmp.lt.u32.totalorder %s3858_s12, %s4382_s4 }
  0xa8   : > { %p3866_p13 = por %p3865_p9, %p3864_p6 }
  0xa9   : > { %p3862_p5 = pneg %p3861_p3 }
  0xaa   : > { %p3868_p4 = por %p3867_p2, %p3866_p13 }
  0xac   : > { %p3869_p8 = pnand %p3868_p4, %p3862_p5 }
  0xae   : > { %3872 = shalt.err (!%p3869_p8)
}
  0xaf   : > { %s3873_s19 = scalar_lea.vmem %s4410_s13, 2048  ;;  %s4060_s8 = smov [#allocation10]  }
  0xb0   : > { %p3874_p7 = scmp.ne.s32.totalorder %s4410_s13, %s3873_s19  ;;  %s3878_s1 = sshll.u32 %s4060_s8, 4  ;;  %s3879_s1 = int_to_ptr.vmem [resolvable:$false] %s3878_s1 }
  0xb1   : > { %s3880_s25 = scalar_lea.vmem %s3879_s1, 4096  ;;  %p3881_p1 = scmp.lt.s32.totalorder %s4410_s13, %s3879_s1 }
  0xb2   : > { %p3876_p0 = pnand %p3874_p7, %p4208_p10  ;;  %p3882_p3 = scmp.lt.s32.totalorder %s3880_s25, %s3873_s19 }
  0xb4   : > { %p3877_p11 = pneg %p3876_p0  ;;  %p3883_p6 = por %p3882_p3, %p3881_p1 }
  0xb6   : > { %p3884_p9 = pnand %p3883_p6, %p3877_p11 }
  0xb8   : > { %3887 = shalt.err (!%p3884_p9)
}
  0xb9   : > { %3478 = dma.hbm_to_vmem [thread:$0]  (!%p5039_p12), %s4382_s4, 2048, %s4410_s13, %s4256_s23, %s4057_s28, %s4057_s28, %s4058_s9  }
  0xba   : > { %s5042_s0 = sld [smem:[#allocation33_spill]]  ;;  %s382_s14 = scalar_lea.vmem [#allocation11], %s4234_s7 }
  0xbb   : > { %s389_s20 = sshll.u32 %s382_s14, 4  ;;  %s379_s19 = scalar_lea.sflag [#allocation12], %s4181_s16  ;;  %s4444_s20 = int_to_ptr.vmem [resolvable:$true] %s389_s20 }
  0xc0   : > { %s4441_s18 = scalar_lea.hbm %s5042_s0, %s4243_s15  ;;  %s3893_s9 = scalar_lea.hbm %s5042_s0, 4096 }
  0xc1   : > { %s3888_s8 = scalar_lea.hbm %s4441_s18, 2048  ;;  %p3894_p4 = scmp.lt.u32.totalorder %s4441_s18, %s5042_s0 }
  0xc2   : > { %p3889_p5 = scmp.ne.s32.totalorder %s4441_s18, %s3888_s8  ;;  %p3895_p8 = scmp.lt.u32.totalorder %s3893_s9, %s3888_s8 }
  0xc3   : > { %p3897_p0 = scmp.lt.u32.totalorder %s3888_s8, %s4441_s18 }
  0xc4   : > { %p3891_p13 = pnand %p3889_p5, %p4208_p10  ;;  %p3896_p7 = por %p3895_p8, %p3894_p4 }
  0xc6   : > { %p3892_p2 = pneg %p3891_p13  ;;  %p3898_p11 = por %p3897_p0, %p3896_p7 }
  0xc8   : > { %p3899_p1 = pnand %p3898_p11, %p3892_p2 }
  0xca   : > { %3902 = shalt.err (!%p3899_p1)
}
  0xcb   : > { %s3903_s7 = scalar_lea.vmem %s4444_s20, 2048  ;;  %s4061_s13 = smov [#allocation11]  }
  0xcc   : > { %p3904_p3 = scmp.ne.s32.totalorder %s4444_s20, %s3903_s7  ;;  %s3908_s1 = sshll.u32 %s4061_s13, 4  ;;  %s3909_s1 = int_to_ptr.vmem [resolvable:$false] %s3908_s1 }
  0xcd   : > { %s3910_s25 = scalar_lea.vmem %s3909_s1, 4096  ;;  %p3911_p5 = scmp.lt.s32.totalorder %s4444_s20, %s3909_s1 }
  0xce   : > { %p3906_p6 = pnand %p3904_p3, %p4208_p10  ;;  %p3912_p13 = scmp.lt.s32.totalorder %s3910_s25, %s3903_s7 }
  0xd0   : > { %p3907_p9 = pneg %p3906_p6  ;;  %p3913_p4 = por %p3912_p13, %p3911_p5 }
  0xd2   : > { %p3914_p8 = pnand %p3913_p4, %p3907_p9 }
  0xd4   : > { %3917 = shalt.err (!%p3914_p8)
}
  0xd5   : > { %3481 = dma.hbm_to_vmem [thread:$0]  (!%p5039_p12), %s4441_s18, 2048, %s4444_s20, %s379_s19, %s5041_s21, %s5041_s21, %s5040_s6  }
  0xd6   : > { %s5043_s17 = sld [smem:[#allocation26_spill]] }
  0xdc   : > { %p5044_p10 = scmp.ne.s32.totalorder %s5043_s17, 0 }
  0xdd   : > { %s5045_s12 = sld [smem:[#allocation20_spill]] (!%p5044_p10) }
  0xde   : > { %401 = sbr.rel (%p5044_p10) target bundleno = 2649 (0xa59), region = 48  ;;  %s5046_s22 = sld [smem:[#allocation28_spill]] (!%p5044_p10) }
  0xe3   : > { %s403_s14 = sand.u32 (!%p5044_p10), 1, %s5045_s12  }
  0xe4   : > { %s4476_s8 = sshll.u32 (!%p5044_p10), %s403_s14, 4  ;;  %s404_s23 = scalar_lea.sflag (!%p5044_p10), [#allocation3], %s403_s14 }
  0xe5   : > { %s407_s28 = scalar_lea.vmem [#allocation2], %s4476_s8  ;;  %p5047_p2 = scmp.ne.s32.totalorder %s5046_s22, 0 }
  0xe7   : > { %3989 = dma.done.wait (%p5047_p2), %s404_s23, 256  }
  0xe8   : > { %3991 = vsyncadd (%p5047_p2), %s404_s23, 4294967040  ;;  %s5048_s16 = sld [smem:[#allocation24_spill]]  ;;  %s5049_s24 = sld [smem:[#allocation19_spill]] }
  0xe9   : > { %s5050_s9 = sld [smem:[#allocation25_spill]] }
  0xee   : > { %s412_s6 = sand.u32 1, %s5048_s16   ;;  %s414_s21 = sand.u32 1, %s5049_s24  }
  0xef   : > { %s2947_s18 = sshll.u32 %s414_s21, 3  ;;  %s413_s20 = scalar_lea.sflag [#allocation6], %s412_s6 }
  0xf0   : > { %s4485_s19 = scalar_lea.vmem [#allocation5], %s2947_s18  ;;  %p5051_p12 = scmp.ne.s32.totalorder %s5050_s9, 0 }
  0xf2   : > { %3993 = dma.done.wait (%p5051_p12), %s413_s20, 6272  }
  0xf3   : > { %3995 = vsyncadd (%p5051_p12), %s413_s20, 4294961024  ;;  %s3446_s15 = smul.u32 384, %s414_s21  ;;  %s2948_s4 = sshll.u32 %s414_s21, 7 }
  0xf4   : > { %s431_s13 = scalar_lea.sflag [#allocation9], %s412_s6  ;;  %s4493_s1 = scalar_lea.vmem [#allocation8], %s2948_s4 }
  0xf5   : > { %s4491_s7 = scalar_lea.vmem [#allocation7], %s3446_s15 }
  0xf6   : > { %3997 = dma.done.wait (%p5051_p12), %s431_s13, 4096  }
  0xf7   : > { %3999 = vsyncadd (%p5051_p12), %s431_s13, 4294963200  ;;  %s4499_s25 = scalar_lea.vmem [#allocation10], %s2948_s4  ;;  %s449_s17 = scalar_lea.sflag [#allocation12], %s414_s21 }
  0xf8   : > { %s4501_s12 = scalar_lea.vmem [#allocation11], %s2948_s4 }
  0xf9   : > { %4001 = dma.done.wait (%p5051_p12), %s449_s17, 2048  }
  0xfa   : > { %4003 = vsyncadd (%p5051_p12), %s449_s17, 4294965248  ;;  %s5052_s22 = sld [smem:[#allocation22_spill]]  ;;  %s5053_s6 = sld [smem:[#allocation31_spill]] }
 0x100   : > { %p509_p7 = scmp.lt.s32.totalorder %s5052_s22, 1  ;;  %p2952_p0 = scmp.ne.s32.totalorder %s5052_s22, 0 }
 0x101   : > { %s5054_s21 = sld [smem:[#allocation21_spill]] (!%p2952_p0)  ;;  %v518_v0 = vld [vmem:[%s407_s28] sm:$0xff] (!%p2952_p0)  ;;  %v519_v1 = vld [vmem:[%s407_s28 + $0x8] sm:$0xff] (!%p2952_p0) }
 0x102   : > { %s510_s14 = scalar_select %p509_p7, %s5052_s22, 1 }
 0x103   : > { %517 = sbr.rel (%p2952_p0) target bundleno = 266 (0x10a), region = 76 }
 0x104   : > { %s2951_s23 = sshll.u32 %s510_s14, 1 }
 0x105   : > { %s4512_s18 = scalar_lea.vmem %s5053_s6, %s2951_s23 }
 0x107   : > { %s2953_s9 = sshll.u32 (!%p2952_p0), %s5054_s21, 4 }
 0x108   : > { %s521_s20 = scalar_lea.vmem (!%p2952_p0), [#allocation13], %s2953_s9 }
 0x109   : > { %522 = vst [vmem:[%s521_s20] sm:$0xff] (!%p2952_p0), %v518_v0  ;;  %523 = vst [vmem:[%s521_s20 + $0x8] sm:$0xff] (!%p2952_p0), %v519_v1 }
 0x10a PF: > { %s5055_s15 = sld [smem:[#allocation21_spill]]  ;;  %v3583_v12 = vld [vmem:[%s4491_s7] sm:$0xff]   ;;  %v553_v17 = vlaneseq  ;;  %v528_v22 = vld [vmem:[%s4485_s19] sm:$0xff]  ;;  %v3584_v35 = vld [vmem:[%s4491_s7 + $0x8] sm:$0xff]   ;;  %vm4063_vm0 = vmmov 0   ;;  %vm1531_vm1 = vcmask 523264  }
 0x10b   : > { %3204 = vmatprep.mubr.bf16.mxu0 %v3583_v12  ;;  %v3585_v36 = vld [vmem:[%s4491_s7 + $0x10] sm:$0xff]   ;;  %v3586_v37 = vld [vmem:[%s4491_s7 + $0x18] sm:$0xff]   ;;  %v3587_v38 = vld [vmem:[%s4491_s7 + $0x20] sm:$0xff]   ;;  %vm1708_vm2 = vcmask 130048   ;;  %s5056_s8 = sld [smem:[#allocation24_spill]]  ;;  %s4065_s28 = smov [#allocation13]  }
 0x10c   : > { %v4526_v20 = vshrl.u32 %v553_v17, 7  ;;  %v3588_v39 = vld [vmem:[%s4491_s7 + $0x28] sm:$0xff]   ;;  %v3589_v40 = vld [vmem:[%s4491_s7 + $0x30] sm:$0xff]   ;;  %v3590_v41 = vld [vmem:[%s4491_s7 + $0x38] sm:$0xff]  }
 0x10d   : > { %v3591_v42 = vld [vmem:[%s4491_s7 + $0x40] sm:$0xff]   ;;  %v3592_v43 = vld [vmem:[%s4491_s7 + $0x48] sm:$0xff]   ;;  %v3593_v44 = vld [vmem:[%s4491_s7 + $0x50] sm:$0xff]  }
 0x10e   : > { %v555_v21 = vsub.s32 0, %v4526_v20  ;;  %v561_v26 = vsub.s32 1, %v4526_v20  ;;  %v3594_v45 = vld [vmem:[%s4491_s7 + $0x58] sm:$0xff]   ;;  %v3595_v46 = vld [vmem:[%s4491_s7 + $0x60] sm:$0xff]   ;;  %v3596_v47 = vld [vmem:[%s4491_s7 + $0x68] sm:$0xff]  }
 0x10f   : > { %v3597_v48 = vld [vmem:[%s4491_s7 + $0x70] sm:$0xff]   ;;  %v3598_v49 = vld [vmem:[%s4491_s7 + $0x78] sm:$0xff]   ;;  %v3599_v50 = vld [vmem:[%s4491_s7 + $0x80] sm:$0xff]  }
 0x110   : > { %s2954_s4 = sshll.u32 %s5055_s15, 4  ;;  %v556_v25 = vrot.slane %v528_v22, %v555_v21  ;;  %v562_v30 = vrot.slane %v528_v22, %v561_v26  ;;  %v3600_v51 = vld [vmem:[%s4491_s7 + $0x88] sm:$0xff]   ;;  %v3601_v52 = vld [vmem:[%s4491_s7 + $0x90] sm:$0xff]   ;;  %v3602_v53 = vld [vmem:[%s4491_s7 + $0x98] sm:$0xff]  }
 0x111   : > { %s4521_s13 = scalar_lea.vmem [#allocation13], %s2954_s4  ;;  %v3603_v54 = vld [vmem:[%s4491_s7 + $0xa0] sm:$0xff]   ;;  %v3604_v55 = vld [vmem:[%s4491_s7 + $0xa8] sm:$0xff]   ;;  %v3605_v56 = vld [vmem:[%s4491_s7 + $0xb0] sm:$0xff]   ;;  %p3483_p11 = scmp.eq.s32.totalorder %s5056_s8, 3 }
 0x112   : > { %v526_v2 = vld [vmem:[%s4521_s13] sm:$0xff]  ;;  %v527_v3 = vld [vmem:[%s4521_s13 + $0x8] sm:$0xff]  ;;  %v3607_v58 = vld [vmem:[%s4491_s7 + $0xc0] sm:$0xff]  }
 0x113   : > { %530 = vadd.xlane.f32.xlu0 %v526_v2  ;;  %v3606_v57 = vld [vmem:[%s4491_s7 + $0xb8] sm:$0xff]   ;;  %v3608_v59 = vld [vmem:[%s4491_s7 + $0xc8] sm:$0xff]   ;;  %v3609_v60 = vld [vmem:[%s4491_s7 + $0xd0] sm:$0xff]  }
 0x114   : > { %v3610_v61 = vld [vmem:[%s4491_s7 + $0xd8] sm:$0xff]   ;;  %v3611_v62 = vld [vmem:[%s4491_s7 + $0xe0] sm:$0xff]   ;;  %v3612_v63 = vld [vmem:[%s4491_s7 + $0xe8] sm:$0xff]  }
 0x115   : > { %v3613_v0 = vld [vmem:[%s4491_s7 + $0xf0] sm:$0xff]   ;;  %v3614_v1 = vld [vmem:[%s4491_s7 + $0xf8] sm:$0xff]  }
 0x117   : > { %532 = vadd.xlane.f32.xlu0 %v527_v3 }
 0x1a0   : > { %v531_v4 = vpop.xlane.xlu0 %530 }
 0x1a1   : > { %v535_v5 = vmul.f32 0.0078125, %v531_v4 }
 0x1a3   : > { %v537_v6 = vsub.f32 %v526_v2, %v535_v5  ;;  %v4062_v2 = vmov 0.0  }
 0x1a4   : > { %v533_v7 = vpop.xlane.xlu0 %532  ;;  %3300 = vmatprep.subr.bf16.mxu1 %v4062_v2  ;;  %3308 = vmatprep.mubr.msk.bf16.mxu1 %vm4063_vm0, %v4062_v2 }
 0x1a5   : > { %v536_v8 = vmul.f32 0.0078125, %v533_v7  ;;  %v539_v9 = vmul.f32 %v537_v6, %v537_v6 }
 0x1a7   : > { %v538_v10 = vsub.f32 %v527_v3, %v536_v8  ;;  %541 = vadd.xlane.f32.xlu1 %v539_v9 }
 0x1a9   : > { %v540_v11 = vmul.f32 %v538_v10, %v538_v10 }
 0x1ab   : > { %543 = vadd.xlane.f32.xlu1 %v540_v11 }
 0x234   : > { %v542_v13 = vpop.xlane.xlu1 %541 }
 0x235   : > { %v545_v14 = vmul.f32 0.0078125, %v542_v13 }
 0x237   : > { %v547_v15 = vadd.f32 1e-05, %v545_v14 }
 0x238   : > { %v544_v16 = vpop.xlane.xlu1 %543 }
 0x239   : > { %3687 = vrsqrt.f32 %v547_v15  ;;  %v546_v18 = vmul.f32 0.0078125, %v544_v16 }
 0x23b   : > { %v548_v19 = vadd.f32 1e-05, %v546_v18 }
 0x23d   : > { %3689 = vrsqrt.f32 %v548_v19 }
 0x243   : > { %v3688_v23 = vpop.eup %3687 }
 0x244   : > { %v551_v24 = vmul.f32 %v3688_v23, %v537_v6 }
 0x246   : > { %v557_v29 = vmul.f32 %v556_v25, %v551_v24 }
 0x247   : > { %v3690_v27 = vpop.eup %3689 }
 0x248   : > { %v552_v28 = vmul.f32 %v3690_v27, %v538_v10  ;;  %v563_v32 = vadd.f32 %v562_v30, %v557_v29 }
 0x24a   : > { %v558_v31 = vmul.f32 %v556_v25, %v552_v28 }
 0x24c   : > { %v564_v33 = vadd.f32 %v562_v30, %v558_v31 }
 0x24e   : > { %v565_v34 = vpack.c.bf16 %v564_v33, %v563_v32 }
 0x250   : > { %3202 = vmatprep.subr.bf16.mxu0 %v565_v34 }
 0x251   : > { %3203 = vmatpush3.bf16.xpose.msra.mxu0 %v565_v34 }
 0x252   : > { %3396 = vmatprep.subr.bf16.mxu0 %v4062_v2 }
 0x258   : > { %3205 = vmatmul.mubr.bf16.vlgmr.msra.gmra.mrb[0].mxu0 %v3584_v35 }
 0x259   : > { %3208 = vmatprep.mubr.bf16.mxu0 %v3585_v36  ;;  %v3615_v36 = vld [vmem:[%s4491_s7 + $0x100] sm:$0xff]  }
 0x260   : > { %3209 = vmatmul.mubr.bf16.gmra.mrb[4].mxu0 %v3586_v37  ;;  %v3616_v37 = vld [vmem:[%s4491_s7 + $0x108] sm:$0xff]  }
 0x261   : > { %3212 = vmatprep.mubr.bf16.mxu0 %v3587_v38  ;;  %v3617_v38 = vld [vmem:[%s4491_s7 + $0x110] sm:$0xff]  }
 0x268   : > { %3213 = vmatmul.mubr.bf16.gmra.mrb[8].mxu0 %v3588_v39 }
 0x269   : > { %3216 = vmatprep.mubr.bf16.mxu0 %v3589_v40 }
 0x270   : > { %3217 = vmatmul.mubr.bf16.gmra.mrb[12].mxu0 %v3590_v41 }
 0x271   : > { %3220 = vmatprep.mubr.bf16.mxu0 %v3591_v42  ;;  %v3618_v42 = vld [vmem:[%s4491_s7 + $0x118] sm:$0xff]  }
 0x278   : > { %3221 = vmatmul.mubr.bf16.gmra.mrb[16].mxu0 %v3592_v43 }
 0x279   : > { %3224 = vmatprep.mubr.bf16.mxu0 %v3593_v44  ;;  %v3619_v44 = vld [vmem:[%s4491_s7 + $0x120] sm:$0xff]  }
 0x280   : > { %3225 = vmatmul.mubr.bf16.gmra.mrb[20].mxu0 %v3594_v45 }
 0x281   : > { %3228 = vmatprep.mubr.bf16.mxu0 %v3595_v46 }
 0x288   : > { %3229 = vmatmul.mubr.bf16.gmra.mrb[24].mxu0 %v3596_v47 }
 0x289   : > { %3232 = vmatprep.mubr.bf16.mxu0 %v3597_v48 }
 0x290   : > { %3233 = vmatmul.mubr.bf16.gmra.mrb[28].mxu0 %v3598_v49 }
 0x291   : > { %3236 = vmatprep.mubr.bf16.mxu0 %v3599_v50  ;;  %v3620_v50 = vld [vmem:[%s4491_s7 + $0x128] sm:$0xff]  }
 0x298   : > { %3237 = vmatmul.mubr.bf16.gmra.mrb[32].mxu0 %v3600_v51 }
 0x299   : > { %3240 = vmatprep.mubr.bf16.mxu0 %v3601_v52  ;;  %v3621_v52 = vld [vmem:[%s4491_s7 + $0x130] sm:$0xff]  }
 0x2a0   : > { %3241 = vmatmul.mubr.bf16.gmra.mrb[36].mxu0 %v3602_v53 }
 0x2a1   : > { %3244 = vmatprep.mubr.bf16.mxu0 %v3603_v54 }
 0x2a8   : > { %3245 = vmatmul.mubr.bf16.gmra.mrb[40].mxu0 %v3604_v55 }
 0x2a9   : > { %3248 = vmatprep.mubr.bf16.mxu0 %v3605_v56 }
 0x2b0   : > { %3249 = vmatmul.mubr.bf16.gmra.mrb[44].mxu0 %v3606_v57 }
 0x2b1   : > { %3252 = vmatprep.mubr.bf16.mxu0 %v3607_v58  ;;  %v3622_v58 = vld [vmem:[%s4491_s7 + $0x138] sm:$0xff]  }
 0x2b8   : > { %3253 = vmatmul.mubr.bf16.gmra.mrb[48].mxu0 %v3608_v59 }
 0x2b9   : > { %3256 = vmatprep.mubr.bf16.mxu0 %v3609_v60  ;;  %v3623_v60 = vld [vmem:[%s4491_s7 + $0x140] sm:$0xff]  }
 0x2c0   : > { %3257 = vmatmul.mubr.bf16.gmra.mrb[52].mxu0 %v3610_v61 }
 0x2c1   : > { %3260 = vmatprep.mubr.bf16.mxu0 %v3611_v62 }
 0x2c8   : > { %3261 = vmatmul.mubr.bf16.gmra.mrb[56].mxu0 %v3612_v63 }
 0x2c9   : > { %3264 = vmatprep.mubr.bf16.mxu0 %v3613_v0 }
 0x2d0   : > { %3265 = vmatmul.mubr.bf16.gmra.mrb[60].mxu0 %v3614_v1 }
 0x2d1   : > { %3268 = vmatprep.mubr.bf16.mxu0 %v3615_v36 }
 0x2d8   : > { %3269 = vmatmul.mubr.bf16.gmra.mrb[64].mxu0 %v3616_v37 }
 0x2d9   : > { %3272 = vmatprep.mubr.bf16.mxu0 %v3617_v38 }
 0x2e0   : > { %3273 = vmatmul.mubr.bf16.gmra.mrb[68].mxu0 %v3618_v42 }
 0x2e1   : > { %3276 = vmatprep.mubr.bf16.mxu0 %v3619_v44 }
 0x2e8   : > { %3277 = vmatmul.mubr.bf16.gmra.mrb[72].mxu0 %v3620_v50  ;;  %v3627_v50 = vld [vmem:[%s4491_s7 + $0x160] sm:$0xff]  }
 0x2e9   : > { %3280 = vmatprep.mubr.bf16.mxu0 %v3621_v52  ;;  %v3629_v52 = vld [vmem:[%s4491_s7 + $0x170] sm:$0xff]  }
 0x2f0   : > { %3281 = vmatmul.mubr.bf16.gmra.mrb[76].mxu0 %v3622_v58 }
 0x2f1   : > { %3284 = vmatprep.mubr.bf16.mxu0 %v3623_v60 }
 0x32b   : > { %v3206_v3 = vpop.f32.mrb[0].mxu0 }
 0x32c   : > { %v984_v4 = vpop.f32.mrb[1].mxu0 }
 0x32d   : > { %1367 = vxpose.xlu0.b32.start [1/8] (short) (narrow) %v984_v4, 16  ;;  %v3207_v5 = vpop.f32.mrb[2].mxu0 }
 0x32e   : > { %v987_v6 = vpop.f32.mrb[3].mxu0 }
 0x331   : > { %1368 = vxpose.xlu0.b32.cont [2/8] (short) (narrow) %v987_v6, 16 }
 0x333   : > { %v3210_v7 = vpop.f32.mrb[4].mxu0 }
 0x334   : > { %v1000_v8 = vpop.f32.mrb[5].mxu0 }
 0x335   : > { %1369 = vxpose.xlu0.b32.cont [3/8] (short) (narrow) %v3206_v3, 16  ;;  %v3211_v9 = vpop.f32.mrb[6].mxu0  ;;  %v3624_v3 = vld [vmem:[%s4491_s7 + $0x148] sm:$0xff]  }
 0x336   : > { %v1003_v10 = vpop.f32.mrb[7].mxu0  ;;  %3285 = vmatmul.mubr.bf16.gmra.mrb[80].mxu0 %v3624_v3 }
 0x339   : > { %1370 = vxpose.xlu0.b32.cont [4/8] (short) (narrow) %v3207_v5, 16  ;;  %v3625_v5 = vld [vmem:[%s4491_s7 + $0x150] sm:$0xff]  }
 0x33a   : > { %3288 = vmatprep.mubr.bf16.mxu0 %v3625_v5 }
 0x33b   : > { %v3214_v11 = vpop.f32.mrb[8].mxu0 }
 0x33c   : > { %v1016_v12 = vpop.f32.mrb[9].mxu0 }
 0x33d   : > { %1371 = vxpose.xlu0.b32.cont [5/8] (short) (narrow) %v1000_v8, 16  ;;  %1399 = vxpose.xlu1.b32.start [1/8] (short) (narrow) %v1016_v12, 16  ;;  %v3215_v13 = vpop.f32.mrb[10].mxu0 }
 0x33e   : > { %v1019_v14 = vpop.f32.mrb[11].mxu0 }
 0x341   : > { %1372 = vxpose.xlu0.b32.cont [6/8] (short) (narrow) %v1003_v10, 16  ;;  %1400 = vxpose.xlu1.b32.cont [2/8] (short) (narrow) %v1019_v14, 16 }
 0x343   : > { %v3218_v15 = vpop.f32.mrb[12].mxu0 }
 0x344   : > { %v1032_v16 = vpop.f32.mrb[13].mxu0 }
 0x345   : > { %1373 = vxpose.xlu0.b32.cont [7/8] (short) (narrow) %v3210_v7, 16  ;;  %1401 = vxpose.xlu1.b32.cont [3/8] (short) (narrow) %v3214_v11, 16  ;;  %v3219_v17 = vpop.f32.mrb[14].mxu0  ;;  %v3626_v11 = vld [vmem:[%s4491_s7 + $0x158] sm:$0xff]  }
 0x346   : > { %v1035_v18 = vpop.f32.mrb[15].mxu0  ;;  %3289 = vmatmul.mubr.bf16.gmra.mrb[84].mxu0 %v3626_v11 }
 0x347   : > { %3292 = vmatprep.mubr.bf16.mxu0 %v3627_v50 }
 0x349   : > { %1374 = vxpose.xlu0.b32.end [8/8] (short) (narrow) %v3211_v9, 16  ;;  %1402 = vxpose.xlu1.b32.cont [4/8] (short) (narrow) %v3215_v13, 16 }
 0x34b   : > { %v3222_v19 = vpop.f32.mrb[16].mxu0 }
 0x34c   : > { %v1048_v22 = vpop.f32.mrb[17].mxu0 }
 0x34d   : > { %1403 = vxpose.xlu1.b32.cont [5/8] (short) (narrow) %v1032_v16, 16  ;;  %1431 = vxpose.xlu0.b32.start [1/8] (short) (narrow) %v1048_v22, 16  ;;  %v3223_v23 = vpop.f32.mrb[18].mxu0 }
 0x34e   : > { %v1051_v24 = vpop.f32.mrb[19].mxu0 }
 0x351   : > { %1404 = vxpose.xlu1.b32.cont [6/8] (short) (narrow) %v1035_v18, 16  ;;  %1432 = vxpose.xlu0.b32.cont [2/8] (short) (narrow) %v1051_v24, 16 }
 0x353   : > { %v3226_v25 = vpop.f32.mrb[20].mxu0 }
 0x354   : > { %v1064_v27 = vpop.f32.mrb[21].mxu0 }
 0x355   : > { %1405 = vxpose.xlu1.b32.cont [7/8] (short) (narrow) %v3218_v15, 16  ;;  %1433 = vxpose.xlu0.b32.cont [3/8] (short) (narrow) %v3222_v19, 16  ;;  %v3227_v28 = vpop.f32.mrb[22].mxu0 }
 0x356   : > { %v1067_v29 = vpop.f32.mrb[23].mxu0 }
 0x359   : > { %1406 = vxpose.xlu1.b32.end [8/8] (short) (narrow) %v3219_v17, 16  ;;  %1434 = vxpose.xlu0.b32.cont [4/8] (short) (narrow) %v3223_v23, 16 }
 0x35b   : > { %v3230_v30 = vpop.f32.mrb[24].mxu0 }
 0x35c   : > { %v1080_v31 = vpop.f32.mrb[25].mxu0 }
 0x35d   : > { %1435 = vxpose.xlu0.b32.cont [5/8] (short) (narrow) %v1064_v27, 16  ;;  %1463 = vxpose.xlu1.b32.start [1/8] (short) (narrow) %v1080_v31, 16  ;;  %v3231_v32 = vpop.f32.mrb[26].mxu0 }
 0x35e   : > { %v1083_v33 = vpop.f32.mrb[27].mxu0 }
 0x361   : > { %1436 = vxpose.xlu0.b32.cont [6/8] (short) (narrow) %v1067_v29, 16  ;;  %1464 = vxpose.xlu1.b32.cont [2/8] (short) (narrow) %v1083_v33, 16 }
 0x363   : > { %v3234_v34 = vpop.f32.mrb[28].mxu0 }
 0x364   : > { %v1096_v35 = vpop.f32.mrb[29].mxu0 }
 0x365   : > { %1437 = vxpose.xlu0.b32.cont [7/8] (short) (narrow) %v3226_v25, 16  ;;  %1465 = vxpose.xlu1.b32.cont [3/8] (short) (narrow) %v3230_v30, 16  ;;  %v3235_v39 = vpop.f32.mrb[30].mxu0 }
 0x366   : > { %v1099_v40 = vpop.f32.mrb[31].mxu0 }
 0x369   : > { %1438 = vxpose.xlu0.b32.end [8/8] (short) (narrow) %v3227_v28, 16  ;;  %1466 = vxpose.xlu1.b32.cont [4/8] (short) (narrow) %v3231_v32, 16 }
 0x36b   : > { %v3238_v41 = vpop.f32.mrb[32].mxu0 }
 0x36c   : > { %v1112_v43 = vpop.f32.mrb[33].mxu0 }
 0x36d   : > { %1467 = vxpose.xlu1.b32.cont [5/8] (short) (narrow) %v1096_v35, 16  ;;  %v3239_v45 = vpop.f32.mrb[34].mxu0 }
 0x36e   : > { %v1500_v46 = vpack.c.bf16 %v3239_v45, %v3238_v41  ;;  %v1115_v47 = vpop.f32.mrb[35].mxu0 }
 0x36f   : > { %v1499_v48 = vpack.c.bf16 %v1115_v47, %v1112_v43 }
 0x371   : > { %1468 = vxpose.xlu1.b32.cont [6/8] (short) (narrow) %v1099_v40, 16  ;;  %3301 = vmatpush3.bf16.msra.mxu1 %v1499_v48 }
 0x372   : > { %3302 = vmatprep.subr.bf16.mxu1 %v4062_v2 }
 0x373   : > { %v3242_v49 = vpop.f32.mrb[36].mxu0 }
 0x374   : > { %v1128_v51 = vpop.f32.mrb[37].mxu0 }
 0x375   : > { %1469 = vxpose.xlu1.b32.cont [7/8] (short) (narrow) %v3234_v34, 16  ;;  %v3243_v53 = vpop.f32.mrb[38].mxu0  ;;  %3303 = vmatpush3.bf16.msra.mxu1 %v1500_v46 }
 0x376   : > { %v1502_v54 = vpack.c.bf16 %v3243_v53, %v3242_v49  ;;  %v1131_v55 = vpop.f32.mrb[39].mxu0  ;;  %3304 = vmatprep.subr.bf16.mxu1 %v4062_v2  ;;  %v3630_v53 = vld [vmem:[%s4491_s7 + $0x178] sm:$0xff]  }
 0x377   : > { %v1501_v56 = vpack.c.bf16 %v1131_v55, %v1128_v51  ;;  %v3628_v51 = vld [vmem:[%s4491_s7 + $0x168] sm:$0xff]  }
 0x378   : > { %3293 = vmatmul.mubr.bf16.gmra.mrb[88].mxu0 %v3628_v51 }
 0x379   : > { %1470 = vxpose.xlu1.b32.end [8/8] (short) (narrow) %v3235_v39, 16  ;;  %3305 = vmatpush3.bf16.msra.mxu1 %v1501_v56 }
 0x37a   : > { %3306 = vmatprep.subr.bf16.mxu1 %v4062_v2  ;;  %3296 = vmatprep.mubr.bf16.mxu0 %v3629_v52 }
 0x37b   : > { %v3246_v57 = vpop.f32.mrb[40].mxu0 }
 0x37c   : > { %v1144_v59 = vpop.f32.mrb[41].mxu0 }
 0x37d   : > { %3307 = vmatpush3.bf16.msra.mxu1 %v1502_v54  ;;  %v3247_v61 = vpop.f32.mrb[42].mxu0 }
 0x37e   : > { %v1504_v62 = vpack.c.bf16 %v3247_v61, %v3246_v57  ;;  %v1147_v63 = vpop.f32.mrb[43].mxu0  ;;  %3312 = vmatprep.subr.bf16.mxu1 %v4062_v2 }
 0x37f   : > { %v1503_v0 = vpack.c.bf16 %v1147_v63, %v1144_v59 }
 0x380   : > { %3297 = vmatmul.mubr.bf16.gmra.mrb[92].mxu0 %v3630_v53 }
 0x381   : > { %3404 = vmatprep.mubr.msk.bf16.mxu0 %vm4063_vm0, %v4062_v2 }
 0x383   : > { %v3250_v1 = vpop.f32.mrb[44].mxu0 }
 0x384   : > { %v1160_v4 = vpop.f32.mrb[45].mxu0 }
 0x385   : > { %v3251_v6 = vpop.f32.mrb[46].mxu0 }
 0x386   : > { %v1506_v7 = vpack.c.bf16 %v3251_v6, %v3250_v1  ;;  %v1163_v8 = vpop.f32.mrb[47].mxu0 }
 0x387   : > { %v1505_v9 = vpack.c.bf16 %v1163_v8, %v1160_v4 }
 0x38b   : > { %v3254_v10 = vpop.f32.mrb[48].mxu0 }
 0x38c   : > { %v1176_v12 = vpop.f32.mrb[49].mxu0 }
 0x38d   : > { %v3255_v13 = vpop.f32.mrb[50].mxu0 }
 0x38e   : > { %v1508_v14 = vpack.c.bf16 %v3255_v13, %v3254_v10  ;;  %v1179_v15 = vpop.f32.mrb[51].mxu0 }
 0x38f   : > { %v1507_v16 = vpack.c.bf16 %v1179_v15, %v1176_v12 }
 0x393   : > { %v3258_v17 = vpop.f32.mrb[52].mxu0 }
 0x394   : > { %v1192_v18 = vpop.f32.mrb[53].mxu0 }
 0x395   : > { %v3259_v19 = vpop.f32.mrb[54].mxu0 }
 0x396   : > { %v1510_v22 = vpack.c.bf16 %v3259_v19, %v3258_v17  ;;  %v1195_v23 = vpop.f32.mrb[55].mxu0 }
 0x397   : > { %v1509_v24 = vpack.c.bf16 %v1195_v23, %v1192_v18 }
 0x39b   : > { %v3262_v25 = vpop.f32.mrb[56].mxu0 }
 0x39c   : > { %v1208_v27 = vpop.f32.mrb[57].mxu0 }
 0x39d   : > { %v3263_v28 = vpop.f32.mrb[58].mxu0 }
 0x39e   : > { %v1512_v29 = vpack.c.bf16 %v3263_v28, %v3262_v25  ;;  %v1211_v30 = vpop.f32.mrb[59].mxu0 }
 0x39f   : > { %v1511_v31 = vpack.c.bf16 %v1211_v30, %v1208_v27 }
 0x3a3   : > { %v3266_v32 = vpop.f32.mrb[60].mxu0 }
 0x3a4   : > { %v1224_v33 = vpop.f32.mrb[61].mxu0 }
 0x3a5   : > { %v3267_v34 = vpop.f32.mrb[62].mxu0 }
 0x3a6   : > { %v1514_v35 = vpack.c.bf16 %v3267_v34, %v3266_v32  ;;  %v1227_v36 = vpop.f32.mrb[63].mxu0 }
 0x3a7   : > { %v1513_v37 = vpack.c.bf16 %v1227_v36, %v1224_v33 }
 0x3ab   : > { %v3270_v54 = vpop.f32.mrb[64].mxu0 }
 0x3ac   : > { %v1240_v55 = vpop.f32.mrb[65].mxu0 }
 0x3ad   : > { %v1383_v38 = vpop.trf.xlu0  ;;  %v3271_v56 = vpop.f32.mrb[66].mxu0 }
 0x3ae   : > { %v1516_v57 = vpack.c.bf16 %v3271_v56, %v3270_v54  ;;  %v1243_v58 = vpop.f32.mrb[67].mxu0 }
 0x3af   : > { %v1515_v59 = vpack.c.bf16 %v1243_v58, %v1240_v55 }
 0x3b0   : > { %v1792_v4 = vsel %vm1708_vm2, %v1516_v57, 0 }
 0x3b1   : > { %v1384_v39 = vpop.trf.xlu0  ;;  %v1789_v60 = vsel %vm1708_vm2, %v1515_v59, 0 }
 0x3b2   : > { %v1495_v40 = vpack.c.bf16 %v1384_v39, %v1383_v38 }
 0x3b3   : > { %v3274_v61 = vpop.f32.mrb[68].mxu0 }
 0x3b4   : > { %3309 = vmatmul.mubr.msk.bf16.vlgmr.msra.gmra.mrb[0].mxu1 %vm1531_vm1, %v1495_v40 }
 0x3b5   : > { %3313 = vmatpush3.bf16.msra.mxu1 %v1503_v0  ;;  %3320 = vmatprep.mubr.msk.bf16.mxu1 %vm4063_vm0, %v4062_v2 }
 0x3b6   : > { %3314 = vmatprep.subr.bf16.mxu1 %v4062_v2 }
 0x3b9   : > { %3315 = vmatpush3.bf16.msra.mxu1 %v1504_v62  ;;  %v1256_v62 = vpop.f32.mrb[69].mxu0 }
 0x3ba   : > { %3316 = vmatprep.subr.bf16.mxu1 %v4062_v2  ;;  %v3275_v63 = vpop.f32.mrb[70].mxu0 }
 0x3bb   : > { %v1518_v0 = vpack.c.bf16 %v3275_v63, %v3274_v61  ;;  %v1259_v1 = vpop.f32.mrb[71].mxu0 }
 0x3bc   : > { %v1517_v3 = vpack.c.bf16 %v1259_v1, %v1256_v62  ;;  %v4640_v19 = vpop.f32.mrb[72].mxu0 }
 0x3bd   : > { %v1415_v41 = vpop.trf.xlu1  ;;  %3317 = vmatpush3.bf16.msra.mxu1 %v1505_v9  ;;  %v1798_v6 = vsel %vm1708_vm2, %v1518_v0, 0 }
 0x3be   : > { %3318 = vmatprep.subr.bf16.mxu1 %v4062_v2  ;;  %v1795_v5 = vsel %vm1708_vm2, %v1517_v3, 0 }
 0x3c1   : > { %v1416_v42 = vpop.trf.xlu1  ;;  %3319 = vmatpush3.bf16.msra.mxu1 %v1506_v7 }
 0x3c2   : > { %v1496_v43 = vpack.c.bf16 %v1416_v42, %v1415_v41  ;;  %3324 = vmatprep.subr.bf16.mxu1 %v4062_v2 }
 0x3c4   : > { %3321 = vmatmul.mubr.msk.bf16.vlgmr.msra.gmra.mrb[4].mxu1 %vm1531_vm1, %v1496_v43 }
 0x3c5   : > { %3325 = vmatpush3.bf16.msra.mxu1 %v1507_v16  ;;  %3332 = vmatprep.mubr.msk.bf16.mxu1 %vm4063_vm0, %v4062_v2 }
 0x3c6   : > { %3326 = vmatprep.subr.bf16.mxu1 %v4062_v2 }
 0x3c9   : > { %3327 = vmatpush3.bf16.msra.mxu1 %v1508_v14 }
 0x3ca   : > { %3328 = vmatprep.subr.bf16.mxu1 %v4062_v2 }
 0x3cd   : > { %v1447_v44 = vpop.trf.xlu0  ;;  %3329 = vmatpush3.bf16.msra.mxu1 %v1509_v24 }
 0x3ce   : > { %3330 = vmatprep.subr.bf16.mxu1 %v4062_v2 }
 0x3d1   : > { %v1448_v45 = vpop.trf.xlu0  ;;  %3331 = vmatpush3.bf16.msra.mxu1 %v1510_v22  ;;  %v4642_v22 = vpop.f32.mrb[73].mxu0 }
 0x3d2   : > { %v1497_v46 = vpack.c.bf16 %v1448_v45, %v1447_v44  ;;  %3336 = vmatprep.subr.bf16.mxu1 %v4062_v2  ;;  %v4644_v23 = vpop.f32.mrb[74].mxu0 }
 0x3d3   : > { %v1520_v24 = vpack.c.bf16 %v4644_v23, %v4640_v19  ;;  %v4648_v25 = vpop.f32.mrb[75].mxu0 }
 0x3d4   : > { %3333 = vmatmul.mubr.msk.bf16.vlgmr.msra.gmra.mrb[8].mxu1 %vm1531_vm1, %v1497_v46  ;;  %v1519_v27 = vpack.c.bf16 %v4648_v25, %v4642_v22  ;;  %v4660_v34 = vpop.f32.mrb[76].mxu0 }
 0x3d5   : > { %3337 = vmatpush3.bf16.msra.mxu1 %v1511_v31  ;;  %3344 = vmatprep.mubr.msk.bf16.mxu1 %vm4063_vm0, %v4062_v2 }
 0x3d6   : > { %3338 = vmatprep.subr.bf16.mxu1 %v4062_v2 }
 0x3d9   : > { %3339 = vmatpush3.bf16.msra.mxu1 %v1512_v29 }
 0x3da   : > { %3340 = vmatprep.subr.bf16.mxu1 %v4062_v2 }
 0x3dd   : > { %v1479_v47 = vpop.trf.xlu1  ;;  %3341 = vmatpush3.bf16.msra.mxu1 %v1513_v37 }
 0x3de   : > { %3342 = vmatprep.subr.bf16.mxu1 %v4062_v2 }
 0x3e1   : > { %v1480_v48 = vpop.trf.xlu1  ;;  %3343 = vmatpush3.bf16.msra.mxu1 %v1514_v35  ;;  %v4662_v35 = vpop.f32.mrb[77].mxu0 }
 0x3e2   : > { %v1498_v49 = vpack.c.bf16 %v1480_v48, %v1479_v47  ;;  %3348 = vmatprep.subr.bf16.mxu1 %v4062_v2  ;;  %v4664_v36 = vpop.f32.mrb[78].mxu0 }
 0x3e3   : > { %v1522_v37 = vpack.c.bf16 %v4664_v36, %v4660_v34  ;;  %v4668_v38 = vpop.f32.mrb[79].mxu0 }
 0x3e4   : > { %3345 = vmatmul.mubr.msk.bf16.vlgmr.msra.gmra.mrb[12].mxu1 %vm1531_vm1, %v1498_v49  ;;  %v1521_v39 = vpack.c.bf16 %v4668_v38, %v4662_v35 }
 0x3e5   : > { %3356 = vmatprep.mubr.msk.bf16.mxu1 %vm4063_vm0, %v4062_v2 }
 0x3e6   : > { %v1851_v23 = vsel %vm1708_vm2, %v1521_v39, 0 }
 0x3ea   : > { %3349 = vmatpush3.bf16.xpose.msra.mxu1 %v1789_v60 }
 0x3eb   : > { %3350 = vmatprep.subr.bf16.mxu1 %v4062_v2 }
 0x3f2   : > { %3351 = vmatpush3.bf16.xpose.msra.mxu1 %v1792_v4 }
 0x3f3   : > { %3352 = vmatprep.subr.bf16.mxu1 %v4062_v2 }
 0x3fa   : > { %3353 = vmatpush3.bf16.xpose.msra.mxu1 %v1795_v5 }
 0x3fb   : > { %3354 = vmatprep.subr.bf16.mxu1 %v4062_v2 }
 0x402   : > { %3355 = vmatpush3.bf16.xpose.msra.mxu1 %v1798_v6 }
 0x403   : > { %3360 = vmatprep.subr.bf16.mxu1 %v4062_v2 }
 0x409   : > { %v4680_v46 = vpop.f32.mrb[80].mxu0 }
 0x40a   : > { %v4682_v47 = vpop.f32.mrb[81].mxu0 }
 0x40b   : > { %v4684_v48 = vpop.f32.mrb[82].mxu0 }
 0x40c   : > { %v1524_v49 = vpack.c.bf16 %v4684_v48, %v4680_v46  ;;  %v4688_v50 = vpop.f32.mrb[83].mxu0 }
 0x40d   : > { %v1523_v51 = vpack.c.bf16 %v4688_v50, %v4682_v47 }
 0x40f   : > { %v1901_v36 = vsel %vm1708_vm2, %v1523_v51, 0 }
 0x419   : > { %v4692_v52 = vpop.f32.mrb[84].mxu0 }
 0x41a   : > { %v4694_v53 = vpop.f32.mrb[85].mxu0 }
 0x41b   : > { %v4696_v54 = vpop.f32.mrb[86].mxu0 }
 0x41c   : > { %v1526_v55 = vpack.c.bf16 %v4696_v54, %v4692_v52  ;;  %v4700_v56 = vpop.f32.mrb[87].mxu0 }
 0x41d   : > { %v1525_v57 = vpack.c.bf16 %v4700_v56, %v4694_v53 }
 0x41e   : > { %v1910_v48 = vsel %vm1708_vm2, %v1526_v55, 0  ;;  %v3634_v55 = vld [vmem:[%s4493_s1 + $0x18] sm:$0xff]  }
 0x41f   : > { %v1907_v46 = vsel %vm1708_vm2, %v1525_v57, 0  ;;  %v3635_v57 = vld [vmem:[%s4493_s1 + $0x20] sm:$0xff]  }
 0x44b   : > { %v4704_v58 = vpop.f32.mrb[88].mxu0 }
 0x44c   : > { %v4706_v59 = vpop.f32.mrb[89].mxu0 }
 0x44d   : > { %v4708_v60 = vpop.f32.mrb[90].mxu0 }
 0x44e   : > { %v1528_v61 = vpack.c.bf16 %v4708_v60, %v4704_v58  ;;  %v4712_v62 = vpop.f32.mrb[91].mxu0  ;;  %v3636_v58 = vld [vmem:[%s4493_s1 + $0x28] sm:$0xff]   ;;  %v3638_v60 = vld [vmem:[%s4493_s1 + $0x38] sm:$0xff]  }
 0x44f   : > { %v1527_v63 = vpack.c.bf16 %v4712_v62, %v4706_v59  ;;  %v3637_v59 = vld [vmem:[%s4493_s1 + $0x30] sm:$0xff]  }
 0x450   : > { %v1960_v52 = vsel %vm1708_vm2, %v1528_v61, 0 }
 0x451   : > { %v1957_v53 = vsel %vm1708_vm2, %v1527_v63, 0 }
 0x453   : > { %v4716_v0 = vpop.f32.mrb[92].mxu0 }
 0x454   : > { %v4718_v1 = vpop.f32.mrb[93].mxu0 }
 0x455   : > { %v4720_v3 = vpop.f32.mrb[94].mxu0 }
 0x456   : > { %v1530_v4 = vpack.c.bf16 %v4720_v3, %v4716_v0  ;;  %v4724_v5 = vpop.f32.mrb[95].mxu0 }
 0x457   : > { %v1529_v6 = vpack.c.bf16 %v4724_v5, %v4718_v1 }
 0x458   : > { %v1966_v56 = vsel %vm1708_vm2, %v1530_v4, 0 }
 0x459   : > { %v1963_v54 = vsel %vm1708_vm2, %v1529_v6, 0 }
 0x487   : > { %v4624_v7 = vpop.f32.mrb[0].mxu1 }
 0x488   : > { %v3310_v8 = vpop.f32.mrb[1].mxu1  ;;  %v1709_v9 = vsel %vm1708_vm2, %v4624_v7, -inf }
 0x489   : > { %1710 = vmax.xlane.f32.xlu0 %v1709_v9  ;;  %v4628_v10 = vpop.f32.mrb[2].mxu1  ;;  %v3631_v8 = vld [vmem:[%s4493_s1] sm:$0xff]  }
 0x48a   : > { %v3311_v11 = vpop.f32.mrb[3].mxu1  ;;  %v1712_v12 = vsel %vm1708_vm2, %v4628_v10, -inf  ;;  %3397 = vmatpush3.bf16.msra.mxu0 %v3631_v8 }
 0x48b   : > { %1713 = vmax.xlane.f32.xlu1 %v1712_v12  ;;  %3398 = vmatprep.subr.bf16.mxu0 %v4062_v2 }
 0x497   : > { %v4632_v13 = vpop.f32.mrb[4].mxu1 }
 0x498   : > { %v3322_v14 = vpop.f32.mrb[5].mxu1  ;;  %v1715_v15 = vsel %vm1708_vm2, %v4632_v13, -inf }
 0x499   : > { %1716 = vmax.xlane.f32.xlu0 %v1715_v15  ;;  %v4636_v16 = vpop.f32.mrb[6].mxu1 }
 0x49a   : > { %v1718_v17 = vsel %vm1708_vm2, %v4636_v16, -inf  ;;  %v3323_v18 = vpop.f32.mrb[7].mxu1 }
 0x49b   : > { %1719 = vmax.xlane.f32.xlu1 %v1718_v17 }
 0x4a7   : > { %v4652_v28 = vpop.f32.mrb[8].mxu1 }
 0x4a8   : > { %v3334_v29 = vpop.f32.mrb[9].mxu1  ;;  %v1721_v30 = vsel %vm1708_vm2, %v4652_v28, -inf }
 0x4a9   : > { %1722 = vmax.xlane.f32.xlu0 %v1721_v30  ;;  %v4656_v31 = vpop.f32.mrb[10].mxu1 }
 0x4aa   : > { %v1724_v32 = vsel %vm1708_vm2, %v4656_v31, -inf  ;;  %v3335_v33 = vpop.f32.mrb[11].mxu1 }
 0x4ab   : > { %1725 = vmax.xlane.f32.xlu1 %v1724_v32 }
 0x4b7   : > { %v4672_v40 = vpop.f32.mrb[12].mxu1 }
 0x4b8   : > { %v3346_v41 = vpop.f32.mrb[13].mxu1  ;;  %v1727_v42 = vsel %vm1708_vm2, %v4672_v40, -inf }
 0x4b9   : > { %1728 = vmax.xlane.f32.xlu0 %v1727_v42  ;;  %v4676_v43 = vpop.f32.mrb[14].mxu1 }
 0x4ba   : > { %v1730_v44 = vsel %vm1708_vm2, %v4676_v43, -inf  ;;  %v3347_v45 = vpop.f32.mrb[15].mxu1 }
 0x4bb   : > { %1731 = vmax.xlane.f32.xlu1 %v1730_v44 }
 0x516   : > { %v1711_v9 = vpop.xlane.xlu0 %1710 }
 0x517   : > { %v1733_v11 = vsub.f32 %v4624_v7, %v1711_v9 }
 0x518   : > { %v1714_v12 = vpop.xlane.xlu1 %1713 }
 0x519   : > { %v1741_v14 = vmul.f32 1.442695, %v1733_v11  ;;  %v1734_v15 = vsub.f32 %v4628_v10, %v1714_v12  ;;  %v1845_v10 = vsel %vm1708_vm2, %v1519_v27, 0  ;;  %v3632_v11 = vld [vmem:[%s4493_s1 + $0x8] sm:$0xff]  }
 0x51a   : > { %3399 = vmatpush3.bf16.msra.mxu0 %v3632_v11 }
 0x51b   : > { %3691 = vpow2.f32 %v1741_v14  ;;  %v1743_v17 = vmul.f32 1.442695, %v1734_v15  ;;  %3400 = vmatprep.subr.bf16.mxu0 %v4062_v2 }
 0x51d   : > { %3693 = vpow2.f32 %v1743_v17 }
 0x525   : > { %v3692_v18 = vpop.eup %3691 }
 0x526   : > { %v1717_v29 = vpop.xlane.xlu0 %1716  ;;  %v1757_v30 = vsel %vm1708_vm2, %v3692_v18, 0.0 }
 0x527   : > { %v3694_v32 = vpop.eup %3693  ;;  %v1735_v33 = vsub.f32 %v4632_v13, %v1717_v29  ;;  %1758 = vadd.xlane.f32.xlu0 %v1757_v30  ;;  %v1848_v13 = vsel %vm1708_vm2, %v1520_v24, 0 }
 0x528   : > { %v1720_v41 = vpop.xlane.xlu1 %1719  ;;  %v1760_v42 = vsel %vm1708_vm2, %v3694_v32, 0.0  ;;  %v1781_v44 = vpack.c.bf16 %v3694_v32, %v3692_v18 }
 0x529   : > { %v1745_v7 = vmul.f32 1.442695, %v1735_v33  ;;  %v1736_v45 = vsub.f32 %v4636_v16, %v1720_v41  ;;  %1761 = vadd.xlane.f32.xlu1 %v1760_v42 }
 0x52a   : > { %3357 = vmatmul.mubr.msk.bf16.vlgmr.msra.gmra.mrb[16].mxu1 %vm1708_vm2, %v1781_v44  ;;  %v3639_v44 = vld [vmem:[%s4493_s1 + $0x40] sm:$0xff]  }
 0x52b   : > { %3695 = vpow2.f32 %v1745_v7  ;;  %v1747_v8 = vmul.f32 1.442695, %v1736_v45  ;;  %3361 = vmatpush3.bf16.xpose.msra.mxu1 %v1845_v10  ;;  %3368 = vmatprep.mubr.msk.bf16.mxu1 %vm4063_vm0, %v4062_v2  ;;  %v3640_v45 = vld [vmem:[%s4493_s1 + $0x48] sm:$0xff]   ;;  %v3641_v10 = vld [vmem:[%s4493_s1 + $0x50] sm:$0xff]  }
 0x52c   : > { %3362 = vmatprep.subr.bf16.mxu1 %v4062_v2 }
 0x52d   : > { %3697 = vpow2.f32 %v1747_v8  ;;  %v3642_v8 = vld [vmem:[%s4493_s1 + $0x58] sm:$0xff]  }
 0x533   : > { %3363 = vmatpush3.bf16.xpose.msra.mxu1 %v1848_v13 }
 0x534   : > { %3364 = vmatprep.subr.bf16.mxu1 %v4062_v2 }
 0x535   : > { %v3696_v16 = vpop.eup %3695 }
 0x536   : > { %v1723_v22 = vpop.xlane.xlu0 %1722  ;;  %v1763_v25 = vsel %vm1708_vm2, %v3696_v16, 0.0 }
 0x537   : > { %v3698_v27 = vpop.eup %3697  ;;  %v1737_v9 = vsub.f32 %v4652_v28, %v1723_v22  ;;  %1764 = vadd.xlane.f32.xlu0 %v1763_v25  ;;  %v1854_v28 = vsel %vm1708_vm2, %v1522_v37, 0 }
 0x538   : > { %v1726_v12 = vpop.xlane.xlu1 %1725  ;;  %v1766_v14 = vsel %vm1708_vm2, %v3698_v27, 0.0  ;;  %v1782_v15 = vpack.c.bf16 %v3698_v27, %v3696_v16 }
 0x539   : > { %v1749_v17 = vmul.f32 1.442695, %v1737_v9  ;;  %v1738_v19 = vsub.f32 %v4656_v31, %v1726_v12  ;;  %1767 = vadd.xlane.f32.xlu1 %v1766_v14 }
 0x53b   : > { %3699 = vpow2.f32 %v1749_v17  ;;  %v1751_v24 = vmul.f32 1.442695, %v1738_v19  ;;  %3365 = vmatpush3.bf16.xpose.msra.mxu1 %v1851_v23  ;;  %v3643_v17 = vld [vmem:[%s4493_s1 + $0x60] sm:$0xff]   ;;  %v3644_v23 = vld [vmem:[%s4493_s1 + $0x68] sm:$0xff]  }
 0x53c   : > { %3366 = vmatprep.subr.bf16.mxu1 %v4062_v2 }
 0x53d   : > { %3701 = vpow2.f32 %v1751_v24  ;;  %v3645_v24 = vld [vmem:[%s4493_s1 + $0x70] sm:$0xff]  }
 0x543   : > { %3367 = vmatpush3.bf16.xpose.msra.mxu1 %v1854_v28  ;;  %v3646_v28 = vld [vmem:[%s4493_s1 + $0x78] sm:$0xff]  }
 0x544   : > { %3372 = vmatprep.subr.bf16.mxu1 %v4062_v2 }
 0x545   : > { %v3700_v31 = vpop.eup %3699 }
 0x546   : > { %v1729_v35 = vpop.xlane.xlu0 %1728  ;;  %v1769_v38 = vsel %vm1708_vm2, %v3700_v31, 0.0 }
 0x547   : > { %v3702_v39 = vpop.eup %3701  ;;  %v1739_v18 = vsub.f32 %v4672_v40, %v1729_v35  ;;  %1770 = vadd.xlane.f32.xlu0 %v1769_v38  ;;  %v1904_v40 = vsel %vm1708_vm2, %v1524_v49, 0  ;;  %v3633_v49 = vld [vmem:[%s4493_s1 + $0x10] sm:$0xff]  }
 0x548   : > { %v1732_v29 = vpop.xlane.xlu1 %1731  ;;  %v1772_v30 = vsel %vm1708_vm2, %v3702_v39, 0.0  ;;  %v1783_v32 = vpack.c.bf16 %v3702_v39, %v3700_v31  ;;  %3401 = vmatpush3.bf16.msra.mxu0 %v3633_v49 }
 0x549   : > { %v1753_v33 = vmul.f32 1.442695, %v1739_v18  ;;  %v1740_v34 = vsub.f32 %v4676_v43, %v1732_v29  ;;  %1773 = vadd.xlane.f32.xlu1 %v1772_v30  ;;  %3402 = vmatprep.subr.bf16.mxu0 %v4062_v2 }
 0x54a   : > { %3369 = vmatmul.mubr.msk.bf16.vlgmr.msra.gmra.mrb[20].mxu1 %vm1708_vm2, %v1782_v15 }
 0x54b   : > { %3703 = vpow2.f32 %v1753_v33  ;;  %v1755_v37 = vmul.f32 1.442695, %v1740_v34  ;;  %3373 = vmatpush3.bf16.xpose.msra.mxu1 %v1901_v36  ;;  %3380 = vmatprep.mubr.msk.bf16.mxu1 %vm4063_vm0, %v4062_v2 }
 0x54c   : > { %3374 = vmatprep.subr.bf16.mxu1 %v4062_v2  ;;  %3403 = vmatpush3.bf16.msra.mxu0 %v3634_v55 }
 0x54d   : > { %3705 = vpow2.f32 %v1755_v37  ;;  %3420 = vmatprep.subr.bf16.mxu0 %v4062_v2 }
 0x553   : > { %3375 = vmatpush3.bf16.xpose.msra.mxu1 %v1904_v40 }
 0x554   : > { %3376 = vmatprep.subr.bf16.mxu1 %v4062_v2 }
 0x555   : > { %v3704_v43 = vpop.eup %3703 }
 0x556   : > { %v1775_v47 = vsel %vm1708_vm2, %v3704_v43, 0.0 }
 0x557   : > { %v3706_v50 = vpop.eup %3705  ;;  %1776 = vadd.xlane.f32.xlu0 %v1775_v47 }
 0x558   : > { %v1778_v51 = vsel %vm1708_vm2, %v3706_v50, 0.0  ;;  %v1784_v41 = vpack.c.bf16 %v3706_v50, %v3704_v43 }
 0x559   : > { %1779 = vadd.xlane.f32.xlu1 %v1778_v51 }
 0x55b   : > { %3377 = vmatpush3.bf16.xpose.msra.mxu1 %v1907_v46 }
 0x55c   : > { %3378 = vmatprep.subr.bf16.mxu1 %v4062_v2 }
 0x563   : > { %3379 = vmatpush3.bf16.xpose.msra.mxu1 %v1910_v48 }
 0x564   : > { %3384 = vmatprep.subr.bf16.mxu1 %v4062_v2 }
 0x56a   : > { %3381 = vmatmul.mubr.msk.bf16.vlgmr.msra.gmra.mrb[24].mxu1 %vm1708_vm2, %v1783_v32 }
 0x56b   : > { %3385 = vmatpush3.bf16.xpose.msra.mxu1 %v1957_v53  ;;  %3392 = vmatprep.mubr.msk.bf16.mxu1 %vm4063_vm0, %v4062_v2 }
 0x56c   : > { %3386 = vmatprep.subr.bf16.mxu1 %v4062_v2 }
 0x573   : > { %3387 = vmatpush3.bf16.xpose.msra.mxu1 %v1960_v52 }
 0x574   : > { %3388 = vmatprep.subr.bf16.mxu1 %v4062_v2 }
 0x57b   : > { %3389 = vmatpush3.bf16.xpose.msra.mxu1 %v1963_v54 }
 0x57c   : > { %3390 = vmatprep.subr.bf16.mxu1 %v4062_v2 }
 0x583   : > { %3391 = vmatpush3.bf16.xpose.msra.mxu1 %v1966_v56 }
 0x584   : > { %3408 = vmatprep.subr.bf16.mxu1 %v4062_v2 }
 0x58a   : > { %3393 = vmatmul.mubr.msk.bf16.vlgmr.msra.gmra.mrb[28].mxu1 %vm1708_vm2, %v1784_v41 }
 0x58b   : > { %3409 = vmatpush3.bf16.msra.mxu1 %v3635_v57  ;;  %3416 = vmatprep.mubr.msk.bf16.mxu1 %vm4063_vm0, %v4062_v2 }
 0x58c   : > { %3410 = vmatprep.subr.bf16.mxu1 %v4062_v2 }
 0x58f   : > { %3411 = vmatpush3.bf16.msra.mxu1 %v3636_v58 }
 0x590   : > { %3412 = vmatprep.subr.bf16.mxu1 %v4062_v2 }
 0x593   : > { %3413 = vmatpush3.bf16.msra.mxu1 %v3637_v59 }
 0x594   : > { %3414 = vmatprep.subr.bf16.mxu1 %v4062_v2 }
 0x597   : > { %3415 = vmatpush3.bf16.msra.mxu1 %v3638_v60 }
 0x598   : > { %3432 = vmatprep.subr.bf16.mxu1 %v4062_v2 }
 0x5b4   : > { %v1759_v61 = vpop.xlane.xlu0 %1758 }
 0x5b5   : > { %3707 = vrcp.f32 %v1759_v61 }
 0x5b6   : > { %v1762_v62 = vpop.xlane.xlu1 %1761 }
 0x5b7   : > { %3709 = vrcp.f32 %v1762_v62 }
 0x5bf   : > { %v3708_v0 = vpop.eup %3707 }
 0x5c1   : > { %v3710_v3 = vpop.eup %3709 }
 0x5c4   : > { %v1765_v13 = vpop.xlane.xlu0 %1764 }
 0x5c5   : > { %3711 = vrcp.f32 %v1765_v13 }
 0x5c6   : > { %v1768_v16 = vpop.xlane.xlu1 %1767 }
 0x5c7   : > { %3713 = vrcp.f32 %v1768_v16 }
 0x5cf   : > { %v3712_v25 = vpop.eup %3711 }
 0x5d1   : > { %v3714_v9 = vpop.eup %3713 }
 0x5d4   : > { %v1771_v31 = vpop.xlane.xlu0 %1770 }
 0x5d5   : > { %3715 = vrcp.f32 %v1771_v31 }
 0x5d6   : > { %v1774_v35 = vpop.xlane.xlu1 %1773 }
 0x5d7   : > { %3717 = vrcp.f32 %v1774_v35 }
 0x5df   : > { %v3716_v39 = vpop.eup %3715 }
 0x5e1   : > { %v3718_v29 = vpop.eup %3717 }
 0x5e4   : > { %v1777_v37 = vpop.xlane.xlu0 %1776 }
 0x5e5   : > { %3719 = vrcp.f32 %v1777_v37  ;;  %v3662_v37 = vld [vmem:[%s4499_s25 + $0x50] ss:$8 sps:$4 sm:$0xff]  }
 0x5e6   : > { %v1780_v40 = vpop.xlane.xlu1 %1779 }
 0x5e7   : > { %3721 = vrcp.f32 %v1780_v40  ;;  %v3667_v40 = vld [vmem:[%s4499_s25 + $0x64] ss:$8 sps:$4 sm:$0xff]  }
 0x5ef   : > { %v3720_v43 = vpop.eup %3719 }
 0x5f1   : > { %v3722_v50 = vpop.eup %3721 }
 0x5fd   : > { %v1834_v63 = vpop.f32.mrb[16].mxu1 }
 0x5fe   : > { %v3358_v1 = vpop.f32.mrb[17].mxu1  ;;  %v2017_v5 = vmul.f32 %v3708_v0, %v1834_v63 }
 0x5ff   : > { %v1837_v4 = vpop.f32.mrb[18].mxu1 }
 0x600   : > { %v2018_v6 = vmul.f32 %v3710_v3, %v1837_v4  ;;  %v3359_v42 = vpop.f32.mrb[19].mxu1 }
 0x602   : > { %v2025_v7 = vpack.c.bf16 %v2018_v6, %v2017_v5  ;;  %v2343_v5 = vsub.s32 2, %v4526_v20 }
 0x604   : > { %3405 = vmatmul.mubr.msk.bf16.vlgmr.msra.gmra.mrb[96].mxu0 %vm1531_vm1, %v2025_v7  ;;  %v4856_v7 = vld [vmem:[%s4485_s19] sm:$0xff]  ;;  %s2737_s19 = sshll.u32 %s4065_s28, 4  ;;  %s2738_s19 = int_to_ptr.vmem [resolvable:$true] %s2737_s19 }
 0x605   : > { %3421 = vmatpush3.bf16.msra.mxu0 %v3639_v44  ;;  %3428 = vmatprep.mubr.msk.bf16.mxu0 %vm4063_vm0, %v4062_v2  ;;  %s3918_s7 = scalar_lea.vmem %s2738_s19, 512  ;;  %p3925_p9 = scmp.lt.s32.totalorder %s2738_s19, %s2738_s19 }
 0x606   : > { %3422 = vmatprep.subr.bf16.mxu0 %v4062_v2  ;;  %p3919_p1 = scmp.ne.s32.totalorder %s2738_s19, %s3918_s7  ;;  %p3926_p5 = scmp.lt.s32.totalorder %s3918_s7, %s3918_s7 }
 0x608   : > { %p3920_p3 = pnand %p3919_p1, %p3483_p11  ;;  %p3927_p13 = por %p3926_p5, %p3925_p9 }
 0x609   : > { %3423 = vmatpush3.bf16.msra.mxu0 %v3640_v45  ;;  %v2344_v45 = vrot.slane %v4856_v7, %v2343_v5 }
 0x60a   : > { %3424 = vmatprep.subr.bf16.mxu0 %v4062_v2  ;;  %p3921_p6 = pneg %p3920_p3 }
 0x60c   : > { %p3928_p4 = pnand %p3927_p13, %p3921_p6 }
 0x60d   : > { %3425 = vmatpush3.bf16.msra.mxu0 %v3641_v10 }
 0x60e   : > { %3426 = vmatprep.subr.bf16.mxu0 %v4062_v2 }
 0x611   : > { %3427 = vmatpush3.bf16.msra.mxu0 %v3642_v8  ;;  %v3736_v8 = vld [vmem:[%s4521_s13] sm:$0xff] }
 0x61d   : > { %v1890_v22 = vpop.f32.mrb[20].mxu1 }
 0x61e   : > { %v3370_v27 = vpop.f32.mrb[21].mxu1  ;;  %v2019_v12 = vmul.f32 %v3712_v25, %v1890_v22  ;;  %v3737_v25 = vld [vmem:[%s4521_s13 + $0x8] sm:$0xff] }
 0x61f   : > { %v1893_v11 = vpop.f32.mrb[22].mxu1 }
 0x620   : > { %v2020_v14 = vmul.f32 %v3714_v9, %v1893_v11  ;;  %v3371_v15 = vpop.f32.mrb[23].mxu1 }
 0x621   : > { %v3652_v15 = vld [vmem:[%s4499_s25 + $0x14] ss:$8 sps:$4 sm:$0xff]  }
 0x622   : > { %v2026_v19 = vpack.c.bf16 %v2020_v14, %v2019_v12  ;;  %v3647_v12 = vld [vmem:[%s4499_s25] ss:$8 sps:$4 sm:$0xff]   ;;  %v3649_v14 = vld [vmem:[%s4499_s25 + $0x4] ss:$8 sps:$4 sm:$0xff]  }
 0x623   : > { %2489 = vmatprep.subr.bf16.mxu0 %v3649_v14  ;;  %v3686_v14 = vld [vmem:[%s4501_s12 + $0x38] sm:$0xff]  }
 0x624   : > { %3417 = vmatmul.mubr.msk.bf16.vlgmr.msra.gmra.mrb[32].mxu1 %vm1531_vm1, %v2026_v19 }
 0x625   : > { %3433 = vmatpush3.bf16.msra.mxu1 %v3643_v17  ;;  %3440 = vmatprep.mubr.msk.bf16.mxu1 %vm4063_vm0, %v4062_v2  ;;  %v3650_v17 = vld [vmem:[%s4499_s25 + $0x10] ss:$8 sps:$4 sm:$0xff]  }
 0x626   : > { %3434 = vmatprep.subr.bf16.mxu1 %v4062_v2 }
 0x629   : > { %3435 = vmatpush3.bf16.msra.mxu1 %v3644_v23 }
 0x62a   : > { %3436 = vmatprep.subr.bf16.mxu1 %v4062_v2 }
 0x62d   : > { %3437 = vmatpush3.bf16.msra.mxu1 %v3645_v24 }
 0x62e   : > { %3438 = vmatprep.subr.bf16.mxu1 %v4062_v2 }
 0x631   : > { %3439 = vmatpush3.bf16.msra.mxu1 %v3646_v28 }
 0x63d   : > { %v1946_v38 = vpop.f32.mrb[24].mxu1 }
 0x63e   : > { %v3382_v18 = vpop.f32.mrb[25].mxu1  ;;  %v2021_v32 = vmul.f32 %v3716_v39, %v1946_v38 }
 0x63f   : > { %v1949_v30 = vpop.f32.mrb[26].mxu1  ;;  %v3655_v18 = vld [vmem:[%s4499_s25 + $0x24] ss:$8 sps:$4 sm:$0xff]  }
 0x640   : > { %v2022_v33 = vmul.f32 %v3718_v29, %v1949_v30  ;;  %v3383_v34 = vpop.f32.mrb[27].mxu1  ;;  %v3653_v29 = vld [vmem:[%s4499_s25 + $0x20] ss:$8 sps:$4 sm:$0xff]   ;;  %v3658_v30 = vld [vmem:[%s4499_s25 + $0x34] ss:$8 sps:$4 sm:$0xff]  }
 0x641   : > { %v3659_v34 = vld [vmem:[%s4499_s25 + $0x40] ss:$8 sps:$4 sm:$0xff]  }
 0x642   : > { %v2027_v36 = vpack.c.bf16 %v2022_v33, %v2021_v32  ;;  %v3656_v32 = vld [vmem:[%s4499_s25 + $0x30] ss:$8 sps:$4 sm:$0xff]   ;;  %v3661_v33 = vld [vmem:[%s4499_s25 + $0x44] ss:$8 sps:$4 sm:$0xff]  }
 0x644   : > { %3429 = vmatmul.mubr.msk.bf16.vlgmr.msra.gmra.mrb[100].mxu0 %vm1531_vm1, %v2027_v36  ;;  %v3664_v36 = vld [vmem:[%s4499_s25 + $0x54] ss:$8 sps:$4 sm:$0xff]  }
 0x645   : > { %2490 = vmatpush1.bf16.msra.mxu0 %v3647_v12  ;;  %v3685_v12 = vld [vmem:[%s4501_s12 + $0x78] sm:$0xff]  }
 0x646   : > { %2491 = vmatprep.subr.bf16.mxu0 %v3652_v15  ;;  %v529_v15 = vld [vmem:[%s4512_s18] sm:$0x3] }
 0x649   : > { %2492 = vmatpush1.bf16.msra.mxu0 %v3650_v17  ;;  %v2402_v17 = vrot.slane %v529_v15, %v555_v21 }
 0x64a   : > { %2493 = vmatprep.subr.bf16.mxu0 %v3655_v18 }
 0x64d   : > { %2494 = vmatpush1.bf16.msra.mxu0 %v3653_v29 }
 0x64e   : > { %2495 = vmatprep.subr.bf16.mxu0 %v3658_v30 }
 0x651   : > { %2496 = vmatpush1.bf16.msra.mxu0 %v3656_v32 }
 0x652   : > { %2497 = vmatprep.subr.bf16.mxu0 %v3661_v33 }
 0x655   : > { %2498 = vmatpush1.bf16.msra.mxu0 %v3659_v34 }
 0x656   : > { %2499 = vmatprep.subr.bf16.mxu0 %v3664_v36 }
 0x659   : > { %2500 = vmatpush1.bf16.msra.mxu0 %v3662_v37 }
 0x65a   : > { %2501 = vmatprep.subr.bf16.mxu0 %v3667_v40 }
 0x65d   : > { %v2002_v2 = vpop.f32.mrb[28].mxu1 }
 0x65e   : > { %v3394_v47 = vpop.f32.mrb[29].mxu1  ;;  %v2023_v41 = vmul.f32 %v3720_v43, %v2002_v2  ;;  %v3665_v2 = vld [vmem:[%s4499_s25 + $0x60] ss:$8 sps:$4 sm:$0xff]   ;;  %v3670_v43 = vld [vmem:[%s4499_s25 + $0x74] ss:$8 sps:$4 sm:$0xff]  }
 0x65f   : > { %v2005_v51 = vpop.f32.mrb[30].mxu1  ;;  %2502 = vmatpush1.bf16.msra.mxu0 %v3665_v2  ;;  %v3668_v47 = vld [vmem:[%s4499_s25 + $0x70] ss:$8 sps:$4 sm:$0xff]  }
 0x660   : > { %v2024_v46 = vmul.f32 %v3722_v50, %v2005_v51  ;;  %v3395_v48 = vpop.f32.mrb[31].mxu1  ;;  %v4064_v50 = vmov 0   ;;  %2503 = vmatprep.subr.bf16.mxu0 %v3670_v43  ;;  %v3671_v51 = vld [vmem:[%s4501_s12 + $0x40] sm:$0xff]  }
 0x661   : > { %2521 = vmatprep.mubr.bf16.mxu0 %v4064_v50  ;;  %3180 = vmatprep.subr.bf16.mxu1 %v3671_v51  ;;  %v3674_v48 = vld [vmem:[%s4501_s12 + $0x8] sm:$0xff]  }
 0x662   : > { %v2028_v49 = vpack.c.bf16 %v2024_v46, %v2023_v41  ;;  %v3672_v41 = vld [vmem:[%s4501_s12] sm:$0xff]   ;;  %v3673_v46 = vld [vmem:[%s4501_s12 + $0x48] sm:$0xff]  }
 0x663   : > { %2504 = vmatpush1.bf16.msra.mxu0 %v3668_v47 }
 0x664   : > { %3441 = vmatmul.mubr.msk.bf16.vlgmr.msra.gmra.mrb[36].mxu1 %vm1531_vm1, %v2028_v49 }
 0x665   : > { %3181 = vmatpush3.bf16.msra.mxu1 %v3672_v41 }
 0x666   : > { %3182 = vmatprep.subr.bf16.mxu1 %v3673_v46 }
 0x669   : > { %3183 = vmatpush3.bf16.msra.mxu1 %v3674_v48 }
 0x6d7   : > { %v2122_v53 = vpop.f32.mrb[96].mxu0 }
 0x6d8   : > { %v3406_v52 = vpop.f32.mrb[97].mxu0 }
 0x6d9   : > { %v2125_v54 = vpop.f32.mrb[98].mxu0 }
 0x6da   : > { %v3407_v55 = vpop.f32.mrb[99].mxu0 }
 0x6f7   : > { %v2190_v56 = vpop.f32.mrb[32].mxu1 }
 0x6f8   : > { %v2333_v57 = vadd.f32 %v2190_v56, %v2122_v53  ;;  %v3418_v58 = vpop.f32.mrb[33].mxu1 }
 0x6f9   : > { %v2193_v59 = vpop.f32.mrb[34].mxu1 }
 0x6fa   : > { %v2336_v60 = vadd.f32 %v2193_v59, %v2125_v54  ;;  %v3419_v61 = vpop.f32.mrb[35].mxu1  ;;  %v2377_v59 = vsub.s32 4, %v4526_v20 }
 0x717   : > { %v2258_v62 = vpop.f32.mrb[100].mxu0 }
 0x718   : > { %v2334_v63 = vadd.f32 %v2333_v57, %v2258_v62  ;;  %v3430_v0 = vpop.f32.mrb[101].mxu0  ;;  %v2371_v57 = vsub.s32 3, %v4526_v20 }
 0x719   : > { %v2261_v1 = vpop.f32.mrb[102].mxu0 }
 0x71a   : > { %v2337_v3 = vadd.f32 %v2336_v60, %v2261_v1  ;;  %v3431_v4 = vpop.f32.mrb[103].mxu0  ;;  %v2372_v58 = vrot.slane %v4856_v7, %v2371_v57  ;;  %v2378_v1 = vrot.slane %v4856_v7, %v2377_v59 }
 0x737   : > { %v2326_v6 = vpop.f32.mrb[36].mxu1 }
 0x738   : > { %v2335_v42 = vadd.f32 %v2334_v63, %v2326_v6  ;;  %v3442_v44 = vpop.f32.mrb[37].mxu1 }
 0x739   : > { %v2329_v10 = vpop.f32.mrb[38].mxu1  ;;  %v3676_v44 = vld [vmem:[%s4501_s12 + $0x10] sm:$0xff]  }
 0x73a   : > { %v2339_v13 = vadd.f32 %v3736_v8, %v2335_v42  ;;  %v2338_v16 = vadd.f32 %v2337_v3, %v2329_v10  ;;  %v3443_v22 = vpop.f32.mrb[39].mxu1  ;;  %v3675_v42 = vld [vmem:[%s4501_s12 + $0x50] sm:$0xff]   ;;  %v3678_v10 = vld [vmem:[%s4501_s12 + $0x18] sm:$0xff]   ;;  %v3679_v8 = vld [vmem:[%s4501_s12 + $0x60] sm:$0xff]  }
 0x73b   : > { %3184 = vmatprep.subr.bf16.mxu1 %v3675_v42  ;;  %v3682_v22 = vld [vmem:[%s4501_s12 + $0x28] sm:$0xff]  }
 0x73c   : > { %v2340_v27 = vadd.f32 %v3737_v25, %v2338_v16  ;;  %v4861_v9 = vadd.f32 %v2344_v45, %v2339_v13  ;;  %3185 = vmatpush3.bf16.msra.mxu1 %v3676_v44  ;;  %v3680_v13 = vld [vmem:[%s4501_s12 + $0x20] sm:$0xff]   ;;  %v3681_v16 = vld [vmem:[%s4501_s12 + $0x68] sm:$0xff]   ;;  %v3683_v25 = vld [vmem:[%s4501_s12 + $0x70] sm:$0xff]  }
 0x73e   : > { %2347 = vadd.xlane.f32.xlu0 %v4861_v9  ;;  %v4864_v11 = vadd.f32 %v2344_v45, %v2340_v27  ;;  %v3677_v45 = vld [vmem:[%s4501_s12 + $0x58] sm:$0xff]   ;;  %v3684_v27 = vld [vmem:[%s4501_s12 + $0x30] sm:$0xff]  }
 0x73f   : > { %3186 = vmatprep.subr.bf16.mxu1 %v3677_v45 }
 0x740   : > { %2349 = vadd.xlane.f32.xlu1 %v4864_v11  ;;  %3187 = vmatpush3.bf16.msra.mxu1 %v3678_v10 }
 0x741   : > { %3188 = vmatprep.subr.bf16.mxu1 %v3679_v8 }
 0x744   : > { %3189 = vmatpush3.bf16.msra.mxu1 %v3680_v13 }
 0x745   : > { %3190 = vmatprep.subr.bf16.mxu1 %v3681_v16 }
 0x748   : > { %3191 = vmatpush3.bf16.msra.mxu1 %v3682_v22 }
 0x749   : > { %3192 = vmatprep.subr.bf16.mxu1 %v3683_v25 }
 0x74c   : > { %3193 = vmatpush3.bf16.msra.mxu1 %v3684_v27 }
 0x74d   : > { %3194 = vmatprep.subr.bf16.mxu1 %v3685_v12 }
 0x750   : > { %3195 = vmatpush3.bf16.msra.mxu1 %v3686_v14 }
 0x7cb   : > { %v2348_v19 = vpop.xlane.xlu0 %2347 }
 0x7cc   : > { %v2351_v23 = vmul.f32 0.0078125, %v2348_v19  ;;  %v2406_v19 = vrot.slane %v529_v15, %v561_v26 }
 0x7cd   : > { %v2350_v24 = vpop.xlane.xlu1 %2349 }
 0x7ce   : > { %v2353_v28 = vsub.f32 %v4861_v9, %v2351_v23  ;;  %v2352_v31 = vmul.f32 0.0078125, %v2350_v24 }
 0x7d0   : > { %v2354_v35 = vsub.f32 %v4864_v11, %v2352_v31  ;;  %v2355_v38 = vmul.f32 %v2353_v28, %v2353_v28 }
 0x7d2   : > { %2357 = vadd.xlane.f32.xlu0 %v2355_v38  ;;  %v2356_v39 = vmul.f32 %v2354_v35, %v2354_v35 }
 0x7d4   : > { %2359 = vadd.xlane.f32.xlu1 %v2356_v39 }
 0x85f   : > { %v2358_v49 = vpop.xlane.xlu0 %2357 }
 0x860   : > { %v2361_v53 = vmul.f32 0.0078125, %v2358_v49 }
 0x861   : > { %v2360_v52 = vpop.xlane.xlu1 %2359 }
 0x862   : > { %v2363_v54 = vadd.f32 1e-05, %v2361_v53  ;;  %v2362_v55 = vmul.f32 0.0078125, %v2360_v52 }
 0x864   : > { %3723 = vrsqrt.f32 %v2363_v54  ;;  %v2364_v56 = vadd.f32 1e-05, %v2362_v55  ;;  %v2588_v55 = vsub.s32 5, %v4526_v20 }
 0x866   : > { %3725 = vrsqrt.f32 %v2364_v56  ;;  %v2589_v57 = vrot.slane %v4856_v7, %v2588_v55 }
 0x86e   : > { %v3724_v60 = vpop.eup %3723 }
 0x86f   : > { %v2367_v61 = vmul.f32 %v3724_v60, %v2353_v28 }
 0x870   : > { %v3726_v62 = vpop.eup %3725 }
 0x871   : > { %v2368_v63 = vmul.f32 %v3726_v62, %v2354_v35  ;;  %v2373_v0 = vmul.f32 %v2372_v58, %v2367_v61 }
 0x873   : > { %v2374_v3 = vmul.f32 %v2372_v58, %v2368_v63  ;;  %v2379_v4 = vadd.f32 %v2378_v1, %v2373_v0 }
 0x875   : > { %v2380_v5 = vadd.f32 %v2378_v1, %v2374_v3 }
 0x877   : > { %v2381_v6 = vpack.c.bf16 %v2380_v5, %v2379_v4 }
 0x879   : > { %2522 = vmatmul.mubr.bf16.vlgmr.msra.gmra.mrb[104].mxu0 %v2381_v6 }
 0x94c   : > { %v2523_v23 = vpop.f32.mrb[104].mxu0 }
 0x94d   : > { %v2524_v24 = vadd.f32 %v2523_v23, %v2402_v17  ;;  %v2525_v28 = vpop.f32.mrb[105].mxu0 }
 0x94e   : > { %v2526_v31 = vadd.f32 %v2525_v28, %v2406_v19  ;;  %v2527_v35 = vpop.f32.mrb[106].mxu0 }
 0x94f   : > { %v2536_v38 = vmul.f32 0.70710677, %v2524_v24  ;;  %v2528_v39 = vadd.f32 %v2527_v35, %v2402_v17  ;;  %v2529_v18 = vpop.f32.mrb[107].mxu0  ;;  %v2532_v2 = vmul.f32 0.5, %v2524_v24 }
 0x950   : > { %v2537_v29 = vmul.f32 0.70710677, %v2526_v31  ;;  %v2530_v30 = vadd.f32 %v2529_v18, %v2406_v19  ;;  %v2533_v50 = vmul.f32 0.5, %v2526_v31 }
 0x951   : > { %3727 = verf.f32 %v2536_v38  ;;  %v2538_v32 = vmul.f32 0.70710677, %v2528_v39  ;;  %v2534_v43 = vmul.f32 0.5, %v2528_v39 }
 0x952   : > { %3729 = verf.f32 %v2537_v29  ;;  %v2539_v33 = vmul.f32 0.70710677, %v2530_v30  ;;  %v2535_v51 = vmul.f32 0.5, %v2530_v30 }
 0x953   : > { %3731 = verf.f32 %v2538_v32 }
 0x954   : > { %3733 = verf.f32 %v2539_v33 }
 0x95b   : > { %v3728_v21 = vpop.eup %3727 }
 0x95c   : > { %v3730_v34 = vpop.eup %3729  ;;  %v2544_v36 = vadd.f32 1.0, %v3728_v21 }
 0x95d   : > { %v3732_v26 = vpop.eup %3731  ;;  %v2545_v37 = vadd.f32 1.0, %v3730_v34 }
 0x95e   : > { %v3734_v40 = vpop.eup %3733  ;;  %v2546_v47 = vadd.f32 1.0, %v3732_v26  ;;  %v2548_v46 = vmul.f32 %v2544_v36, %v2532_v2 }
 0x95f   : > { %v2547_v41 = vadd.f32 1.0, %v3734_v40  ;;  %v2549_v49 = vmul.f32 %v2545_v37, %v2533_v50 }
 0x960   : > { %v2550_v48 = vmul.f32 %v2546_v47, %v2534_v43 }
 0x961   : > { %v2551_v53 = vmul.f32 %v2547_v41, %v2535_v51 }
 0x962   : > { %v2552_v52 = vpack.c.bf16 %v2550_v48, %v2548_v46 }
 0x963   : > { %v2553_v54 = vpack.c.bf16 %v2551_v53, %v2549_v49 }
 0x965   : > { %2718 = vmatprep.mubr.bf16.mxu1 %v2553_v54 }
 0x966   : > { %2719 = vmatmul.mubr.bf16.vlgmr.msra.gmra.mrb[40].mxu1 %v2552_v52 }
 0xa39   : > { %v3196_v56 = vpop.f32.mrb[40].mxu1 }
 0xa3a   : > { %v3197_v58 = vpop.f32.mrb[41].mxu1 }
 0xa3b   : > { %v3198_v59 = vadd.f32 %v3197_v58, %v3196_v56  ;;  %v3199_v60 = vpop.f32.mrb[42].mxu1 }
 0xa3c   : > { %v3200_v61 = vpop.f32.mrb[43].mxu1 }
 0xa3d   : > { %v2721_v62 = vadd.f32 %v3198_v59, %v2589_v57  ;;  %v3201_v63 = vadd.f32 %v3200_v61, %v3199_v60 }
 0xa3f   : > { %v2727_v0 = vadd.f32 %v2721_v62, %v4861_v9  ;;  %v2724_v1 = vadd.f32 %v3201_v63, %v2589_v57 }
 0xa41   : > { %2729 = vst [vmem:[%s4521_s13] sm:$0xff] %v2727_v0  ;;  %v2728_v20 = vadd.f32 %v2724_v1, %v4864_v11 }
 0xa43   : > { %2730 = vst [vmem:[%s4521_s13 + $0x8] sm:$0xff] %v2728_v20 }
 0xa44   : > { %3931 = shalt.err (!%p3928_p4)
}
 0xa45   : > { %s5057_s17 = sld [smem:[#allocation34_spill]] }
 0xa4b   : > { %s3932_s12 = scalar_lea.hbm %s5057_s17, 512 }
 0xa4c   : > { %p3933_p8 = scmp.ne.s32.totalorder %s5057_s17, %s3932_s12  ;;  %p3938_p12 = scmp.lt.u32.totalorder %s3932_s12, %s5057_s17 }
 0xa4e   : > { %p3934_p10 = pnand %p3933_p8, %p3483_p11 }
 0xa50   : > { %p3935_p2 = pneg %p3934_p10 }
 0xa52   : > { %p3940_p7 = pnand %p3938_p12, %p3935_p2 }
 0xa54   : > { %3943 = shalt.err (!%p3940_p7)
}
 0xa55   : > { %s4066_s24 = smov 128   ;;  %s4067_s6 = smov 8  }
 0xa56   : > { %3460 = dma.vmem_to_hbm [thread:$0]  (%p3483_p11), %s2738_s19, 512, %s5057_s17, [#allocation4], %s4066_s24, %s4066_s24, %s4067_s6  }
 0xa57   : > { %4005 = dma.done.wait (%p3483_p11), [#allocation4], 512  }
 0xa58   : > { %4007 = vsyncadd (%p3483_p11), [#allocation4], 4294966784 }
 0xa59 PF: > { %s30_s11 = sadd.s32 1, %s4050_s11   ;;  %s5058_s24 = sld [smem:[#allocation19_spill]] }
 0xa5a   : > { %p27_p0 = scmp.ge.s32.totalorder %s30_s11, 6   ;;  %s5059_s9 = sld [smem:[#allocation20_spill]] }
 0xa5b   : > { %s5060_s20 = sld [smem:[#allocation23_spill]]  ;;  %s5061_s15 = smov %s5073_s30 }
 0xa5c   : > { %s5062_s4 = sld [smem:[#allocation27_spill]]  ;;  %s5063_s25 = smov %s4018_s26 }
 0xa5d   : > { %s5064_s26 = smov %s4317_s27  ;;  %s5066_s28 = smov %s4030_s29 }
 0xa5e   : > { %s5067_s29 = smov %s4325_s2  ;;  %s5069_s8 = smov %s4046_s10 }
 0xa5f   :  { %29 = sbr.rel (!%p27_p0) target bundleno = 21 (0x15), region = 155 }
 0xa60   : > { %s5065_s27 = smov %s5059_s9  ;;  %s5070_s9 = smov %s5061_s15 }
 0xa61   : > { %s5068_s30 = smov %s5060_s20 }
 0xa62   : > { %s5071_s10 = smov %s5062_s4 }
 0xa66   :  { %2753 = vsyncpa [#allocation3], 1 }
 0xa67   :  { %2755 = vsyncpa [#allocation3 + $0x1], 1 }
 0xa68   :  { %2756 = vsyncpa [#allocation6], 1 }
 0xa69   :  { %2758 = vsyncpa [#allocation6 + $0x1], 1 }
 0xa6a   :  { %2759 = vsyncpa [#allocation9], 1 }
 0xa6b   :  { %2761 = vsyncpa [#allocation9 + $0x1], 1 }
 0xa6c   :  { %2762 = vsyncpa [#allocation12], 1 }
 0xa6d   :  { %2764 = vsyncpa [#allocation12 + $0x1], 1 }
 0xa6e   :  { %2765 = vsyncpa [#allocation4], 1 }
 0xa6f   :  { %2767 = vsyncpa [#allocation4 + $0x1], 1 }

</bundles_post_ra>
